<compile_context>
chip_gen: v7x
topology: tpu7x:2x2x1
jax: 0.10.0
libtpu: 0.0.40
codegen_flags: <defaults>
</compile_context>

<pallas_src>
import functools

import jax
import jax.numpy as jnp
from jax.experimental import pallas as pl
from jax.experimental.pallas import tpu as pltpu


# ----------------------------------------------------------------------------
# Kernel: one grid step = `ns` independent sequences of `seq` tokens each.
#   x_ref  (ns, seq, D)  activations (native dtype, cast to bf16 in-kernel)
#   m_ref  (ns, seq)     f32 key mask (0 == padded)
#   wq/wk/wv/wp (D, D)   bf16 weights (wq pre-scaled by head_dim**-0.5)
#   bp     (1, D)        f32 projection bias
#   o_ref  (ns, seq, D)  output (bf16 by default)
# ----------------------------------------------------------------------------
def _attn_kernel(x_ref, m_ref, wq_ref, wk_ref, wv_ref, wp_ref, bp_ref, o_ref,
                 *, num_heads, head_dim, ns, seq):
    H, hd = num_heads, head_dim
    D = H * hd

    x = x_ref[...].reshape(ns * seq, D).astype(jnp.bfloat16)
    m = m_ref[...].astype(jnp.float32)                       # (ns, seq)

    # q/k/v projections: 3 separate GEMMs, f32 accumulate, immediate bf16 cast.
    def proj(w_ref):
        return jnp.dot(x, w_ref[...],
                       preferred_element_type=jnp.float32).astype(jnp.bfloat16)

    q3 = proj(wq_ref).reshape(ns, seq, D)   # wq pre-scaled -> no score *scale
    k3 = proj(wk_ref).reshape(ns, seq, D)
    v3 = proj(wv_ref).reshape(ns, seq, D)

    # head-batched (H*ns, seq, hd): static lane slices + leading-axis concat
    # only (proven Mosaic lowering path; no 4-D transposes).
    def to_heads(t):
        return jnp.concatenate(
            [t[:, :, h * hd:(h + 1) * hd] for h in range(H)], axis=0)

    qh, kh, vh = to_heads(q3), to_heads(k3), to_heads(v3)

    # scaled dot-product scores; contraction on last dims -> no k.T materialized
    s = jnp.einsum('bqd,bkd->bqk', qh, kh,
                   preferred_element_type=jnp.float32)        # (H*ns, S, S) f32

    # masking via broadcast (leading-dim reshape is free; no H-way mask copies)
    s4 = s.reshape(H, ns, seq, seq)
    key_pad = (m == 0.0)[None, :, None, :]                    # (1, ns, 1, S)
    s4 = jnp.where(key_pad, jnp.float32(-1e30), s4)           # masked_fill(-inf)

    # numerically stable softmax in f32; fully-padded-row zeroing folded into
    # the (H, ns, S, 1) reciprocal (not a second full-slab multiply).
    s4 = s4 - jnp.max(s4, axis=-1, keepdims=True)
    e = jnp.exp(s4)
    denom = jnp.sum(e, axis=-1, keepdims=True)                # (H, ns, S, 1)
    not_fully_padded = (jnp.sum(m, axis=-1, keepdims=True) != 0.0
                        ).astype(jnp.float32)                  # (ns, 1)
    inv = pl.reciprocal(denom, approx=True) * not_fully_padded[None, :, None, :]
    p = (e * inv).astype(jnp.bfloat16).reshape(H * ns, seq, seq)

    oh = jnp.einsum('bqk,bkd->bqd', p, vh,
                    preferred_element_type=jnp.float32)        # (H*ns, S, hd)

    # gather heads back along the lane dim -> (ns*seq, D)
    xo = jnp.concatenate([oh[h * ns:(h + 1) * ns] for h in range(H)], axis=-1)
    xo = xo.reshape(ns * seq, D).astype(jnp.bfloat16)

    out = jnp.dot(xo, wp_ref[...], preferred_element_type=jnp.float32)
    out = out + bp_ref[...]                                    # (1, D) broadcast
    o_ref[...] = out.reshape(ns, seq, D).astype(o_ref.dtype)


# ----------------------------------------------------------------------------
# Wrapper helpers
# ----------------------------------------------------------------------------
def _prep_weights(params, num_heads):
    """Pre-cast weights to bf16 once; fold head_dim**-0.5 into wq (qkv has no
    bias, so scaling the q columns is exactly q*scale)."""
    wqkv, wproj, bproj = params
    D = wproj.shape[0]
    scale = (D // num_heads) ** (-0.5)
    wq = (wqkv[:, 0 * D:1 * D] * scale).astype(jnp.bfloat16)
    wk = wqkv[:, 1 * D:2 * D].astype(jnp.bfloat16)
    wv = wqkv[:, 2 * D:3 * D].astype(jnp.bfloat16)
    wp = wproj.astype(jnp.bfloat16)
    bp = bproj.reshape(1, D).astype(jnp.float32)
    return wq, wk, wv, wp, bp


def _weight_specs(D, grid_rank):
    # Constant index_maps -> weights stay resident across the grid.
    # TODO(synk): mark these pipeline_mode=pl.Buffered(1) once confirmed
    # supported, to drop the second (useless) weight buffer on v7x's 64 MiB VMEM.
    if grid_rank == 1:
        cmap = lambda i: (0, 0)
    else:
        cmap = lambda i, j: (0, 0)
    return [pl.BlockSpec((D, D), cmap) for _ in range(4)] + \
           [pl.BlockSpec((1, D), cmap)]


def _compiler_params(grid_rank):
    # 48 MiB: raises v5e/v6e scoped defaults (16/32 MiB) and leaves headroom
    # below v7x's 64 MiB physical VMEM.
    return pltpu.CompilerParams(
        dimension_semantics=("parallel",) * grid_rank,
        vmem_limit_bytes=48 * 1024 * 1024)


def _pick_block_batch(bk, seq, target_rows=512):
    """Divisor d of bk maximizing (MXU alignment of d*seq, multi/even grid,
    rows) under rows <= target_rows.  target_rows ~ 256-384 on v7x (64 MiB
    VMEM), up to 1024 on v6e."""
    divs = [d for d in range(1, bk + 1) if bk % d == 0]
    fitting = [d for d in divs if d * seq <= target_rows] or [1]

    def score(d):
        rows = d * seq
        if rows % 256 == 0:
            align = 3              # fills v6e/v7x 256-wide MXU
        elif rows % 128 == 0:
            align = 2              # fills v5e 128-wide MXU
        elif rows % 16 == 0:
            align = 1
        else:
            align = 0
        steps = bk // d
        multi = int(steps >= 2) + int(steps >= 2 and steps % 2 == 0)
        return (align, multi, rows)

    return max(fitting, key=score)


# ----------------------------------------------------------------------------
# Runner for the "standard" layout: x (Bk, S, D), mask (Bk, S).
# Used for token attention and as the channel-attention fallback.
# ----------------------------------------------------------------------------
def _run_attn_seq(x, mask, params, num_heads, *, target_rows=512,
                  out_dtype=jnp.bfloat16):
    Bk, S, D = x.shape
    bblk = _pick_block_batch(Bk, S, target_rows)
    grid = (Bk // bblk,)
    wq, wk, wv, wp, bp = _prep_weights(params, num_heads)
    mask3 = mask.reshape(Bk, 1, S).astype(jnp.float32)

    kernel = functools.partial(_attn_kernel, num_heads=num_heads,
                               head_dim=D // num_heads, ns=bblk, seq=S)
    out = pl.pallas_call(
        kernel,
        out_shape=jax.ShapeDtypeStruct((Bk, S, D), out_dtype),
        grid=grid,
        in_specs=[
            pl.BlockSpec((bblk, S, D), lambda i: (i, 0, 0)),      # activations
            pl.BlockSpec((bblk, None, S), lambda i: (i, 0, 0)),   # mask->(bblk,S)
        ] + _weight_specs(D, 1),
        out_specs=pl.BlockSpec((bblk, S, D), lambda i: (i, 0, 0)),
        compiler_params=_compiler_params(1),
    )(x, mask3, wq, wk, wv, wp, bp)
    return out


# ----------------------------------------------------------------------------
# Channel attention with the permute folded into the BlockSpec (D % 128 == 0):
# x viewed as (B, C, T*D); grid (B//bblk, T); per step the DMA gathers the
# (bblk, C, D) lane-window for one t (all C channels), so no XLA transpose and
# no extra HBM pass of the activations in either direction.
# ----------------------------------------------------------------------------
def _run_channel_attn_folded(x, attn_mask, params, num_heads, num_channels, *,
                             target_rows=512, out_dtype=jnp.bfloat16):
    B, N, D = x.shape
    C = num_channels
    T = N // C
    wq, wk, wv, wp, bp = _prep_weights(params, num_heads)

    # batch-of-sequences per step = bblk batches (all at the same t)
    bblk = max([d for d in range(1, B + 1)
                if B % d == 0 and d * C <= target_rows] or [1])
    gb = B // bblk
    # TODO(synk): also block over T within a step (needs an in-kernel
    # (C,tblk,D)->(tblk,C,D) shuffle) when B*C is too small to fill the MXU.

    x_view = x.reshape(B, C, T * D)                       # free reshape
    # per-sequence mask, tiny (B*N floats): (T, B, 1, C) so the BlockSpec's
    # last two dims stay (1, C) == full array dims.
    mask_c = attn_mask.reshape(B, C, T).transpose(2, 0, 1)
    mask_c = mask_c.reshape(T, B, 1, C).astype(jnp.float32)

    kernel = functools.partial(_attn_kernel, num_heads=num_heads,
                               head_dim=D // num_heads, ns=bblk, seq=C)
    out = pl.pallas_call(
        kernel,
        out_shape=jax.ShapeDtypeStruct((B, C, T * D), out_dtype),
        grid=(gb, T),
        in_specs=[
            pl.BlockSpec((bblk, C, D), lambda b, t: (b, 0, t)),        # x slab
            pl.BlockSpec((None, bblk, None, C), lambda b, t: (t, b, 0, 0)),
        ] + _weight_specs(D, 2),
        out_specs=pl.BlockSpec((bblk, C, D), lambda b, t: (b, 0, t)),
        compiler_params=_compiler_params(2),
    )(x_view, mask_c, wq, wk, wv, wp, bp)
    # (B, C, T*D) is exactly the module's (B, C, T, D) output layout.
    return out.reshape(B, N, D)


def _run_channel_attn_fallback(x, attn_mask, params, num_heads, num_channels,
                               **kw):
    # Only used when D is not a multiple of 128 (lane window would be unaligned).
    B, N, D = x.shape
    C = num_channels
    T = N // C
    xr = x.reshape(B, C, T, D).transpose(0, 2, 1, 3).reshape(B * T, C, D)
    mr = attn_mask.reshape(B, C, T).transpose(0, 2, 1).reshape(B * T, C)
    y = _run_attn_seq(xr, mr, params, num_heads, **kw)
    return y.reshape(B, T, C, D).transpose(0, 2, 1, 3).reshape(B, N, D)


# ----------------------------------------------------------------------------
# AlternatingAttention forward (Pallas path).
# attn_drop / proj_drop (p=0.0, eval) and qk_norm=False are identity no-ops.
# ----------------------------------------------------------------------------
def alternating_attention(x, attn_mask, params, *, num_channels, num_heads,
                          block_idx, target_rows=512, out_dtype=jnp.bfloat16,
                          channel_folded=None):
    B, N, D = x.shape
    C = num_channels
    T = N // C
    if block_idx % 2 == 0:
        if channel_folded is None:
            channel_folded = (D % 128 == 0)
        if channel_folded:
            return _run_channel_attn_folded(
                x, attn_mask, params, num_heads, C,
                target_rows=target_rows, out_dtype=out_dtype)
        return _run_channel_attn_fallback(
            x, attn_mask, params, num_heads, C,
            target_rows=target_rows, out_dtype=out_dtype)
    # token attention: (B, C, T, D) -> (B*C, T, D) (free reshapes only)
    xr = x.reshape(B * C, T, D)
    mr = attn_mask.reshape(B * C, T)
    y = _run_attn_seq(xr, mr, params, num_heads,
                      target_rows=target_rows, out_dtype=out_dtype)
    return y.reshape(B, N, D)


# ----------------------------------------------------------------------------
# Pure-JAX f32 reference (mirrors the PyTorch module).
# ----------------------------------------------------------------------------
def _ref_attn(x, mask, params, num_heads):
    Bk, S, D = x.shape
    hd = D // num_heads
    scale = hd ** (-0.5)
    wqkv, wproj, bproj = params
    qkv = x @ wqkv
    qkv = qkv.reshape(Bk, S, 3, num_heads, hd).transpose(2, 0, 3, 1, 4)
    q, k, v = qkv[0], qkv[1], qkv[2]
    q = q * scale
    attn = jnp.einsum('bhqd,bhkd->bhqk', q, k)
    key_pad = (mask == 0.0)[:, None, None, :]
    attn = jnp.where(key_pad, jnp.float32(-1e30), attn)
    attn = jax.nn.softmax(attn, axis=-1)
    fully = (jnp.sum(mask, axis=-1) == 0.0)[:, None, None, None]
    attn = jnp.where(fully, 0.0, attn)
    out = jnp.einsum('bhqk,bhkd->bhqd', attn, v)
    out = out.transpose(0, 2, 1, 3).reshape(Bk, S, D)
    return out @ wproj + bproj.reshape(1, D)


def alternating_attention_ref(x, attn_mask, params, *, num_channels, num_heads,
                              block_idx):
    B, N, D = x.shape
    C = num_channels
    T = N // C
    if block_idx % 2 == 0:
        xr = x.reshape(B, C, T, D).transpose(0, 2, 1, 3).reshape(B * T, C, D)
        mr = attn_mask.reshape(B, C, T).transpose(0, 2, 1).reshape(B * T, C)
        y = _ref_attn(xr, mr, params, num_heads)
        return y.reshape(B, T, C, D).transpose(0, 2, 1, 3).reshape(B, N, D)
    xr = x.reshape(B * C, T, D)
    mr = attn_mask.reshape(B * C, T)
    y = _ref_attn(xr, mr, params, num_heads)
    return y.reshape(B, N, D)


if __name__ == "__main__":
    # Small deterministic shapes; D = 128 keeps the lane dim aligned so the
    # folded channel-attention path is exercised.
    B, C, T, H = 2, 4, 8, 4
    D = 128
    N = C * T
    key = jax.random.PRNGKey(0)
    k1, k2, k3, k4, k5 = jax.random.split(key, 5)

    x = jax.random.normal(k1, (B, N, D), dtype=jnp.float32)

    # Module params (qkv: (3D x D) no bias, proj: (D x D) + bias), stored
    # transposed for x @ W.
    wqkv = jax.random.normal(k2, (D, 3 * D), dtype=jnp.float32) * 0.05
    wproj = jax.random.normal(k3, (D, D), dtype=jnp.float32) * 0.05
    bproj = jax.random.normal(k4, (1, D), dtype=jnp.float32) * 0.05
    params = (wqkv, wproj, bproj)

    # attn_mask (B, N), 0 == padded; layout matches x.view(B, C, T).
    mask3 = (jax.random.uniform(k5, (B, C, T)) > 0.2).astype(jnp.float32)
    mask3 = mask3.at[0, :, 0].set(0.0)     # fully-padded channel-attn sequence
    mask3 = mask3.at[1, 2, :].set(0.0)     # fully-padded token-attn sequence
    attn_mask = mask3.reshape(B, N)

    # (block_idx, channel_folded override): folded channel, token, fallback channel
    cases = [(0, None), (1, None), (0, False)]
    for block_idx, folded in cases:
        y = alternating_attention(
            x, attn_mask, params, num_channels=C, num_heads=H,
            block_idx=block_idx, channel_folded=folded)
        y = jax.block_until_ready(y)
        y_ref = alternating_attention_ref(
            x, attn_mask, params, num_channels=C, num_heads=H,
            block_idx=block_idx)
        assert y.shape == (B, N, D)
        # bf16 matmul operands / bf16 output / approx reciprocal vs f32 reference.
        assert jnp.allclose(y.astype(jnp.float32), y_ref,
                            atol=3e-2, rtol=3e-2), (
            f"mismatch at block_idx={block_idx}, folded={folded}")

    print("KERNEL_OK")
</pallas_src>

<mosaic_0001>
module attributes {stable_mosaic.version = 11 : i64} {
  func.func @_attn_kernel(%arg0: i32, %arg1: i32, %arg2: memref<2x4x128xf32, #tpu.memory_space<vmem>>, %arg3: memref<1x2x1x4xf32, #tpu.memory_space<vmem>>, %arg4: memref<128x128xbf16, #tpu.memory_space<vmem>>, %arg5: memref<128x128xbf16, #tpu.memory_space<vmem>>, %arg6: memref<128x128xbf16, #tpu.memory_space<vmem>>, %arg7: memref<128x128xbf16, #tpu.memory_space<vmem>>, %arg8: memref<1x128xf32, #tpu.memory_space<vmem>>, %arg9: memref<2x4x128xbf16, #tpu.memory_space<vmem>>) attributes {dimension_semantics = [#tpu.dimension_semantics<parallel>, #tpu.dimension_semantics<parallel>], iteration_bounds = array<i64: 1, 8>, scalar_prefetch = 0 : i64, scratch_operands = 0 : i64, tpu.core_type = #tpu.core_type<tc>, window_params = [{transform_indices = @transform_0, window_bounds = array<i64: 2, 4, 128>}, {transform_indices = @transform_1, window_bounds = array<i64: 1, 2, 1, 4>}, {pipeline_mode = #tpu.pipeline_mode<synchronous>, transform_indices = @transform_2, window_bounds = array<i64: 128, 128>}, {pipeline_mode = #tpu.pipeline_mode<synchronous>, transform_indices = @transform_3, window_bounds = array<i64: 128, 128>}, {pipeline_mode = #tpu.pipeline_mode<synchronous>, transform_indices = @transform_4, window_bounds = array<i64: 128, 128>}, {pipeline_mode = #tpu.pipeline_mode<synchronous>, transform_indices = @transform_5, window_bounds = array<i64: 128, 128>}, {pipeline_mode = #tpu.pipeline_mode<synchronous>, transform_indices = @transform_6, window_bounds = array<i64: 1, 128>}, {transform_indices = @transform_7, window_bounds = array<i64: 2, 4, 128>}]} {
    %c0 = arith.constant 0 : index
    %c0_0 = arith.constant 0 : index
    %c0_1 = arith.constant 0 : index
    %0 = vector.load %arg2[%c0, %c0_0, %c0_1] : memref<2x4x128xf32, #tpu.memory_space<vmem>>, vector<2x4x128xf32>
    %1 = vector.shape_cast %0 : vector<2x4x128xf32> to vector<8x128xf32>
    %2 = arith.truncf %1 : vector<8x128xf32> to vector<8x128xbf16>
    %c0_2 = arith.constant 0 : index
    %c0_3 = arith.constant 0 : index
    %c0_4 = arith.constant 0 : index
    %c0_5 = arith.constant 0 : index
    %3 = vector.load %arg3[%c0_2, %c0_3, %c0_4, %c0_5] : memref<1x2x1x4xf32, #tpu.memory_space<vmem>>, vector<1x2x1x4xf32>
    %4 = vector.shape_cast %3 : vector<1x2x1x4xf32> to vector<2x4xf32>
    %c0_6 = arith.constant 0 : index
    %c0_7 = arith.constant 0 : index
    %5 = vector.load %arg4[%c0_6, %c0_7] : memref<128x128xbf16, #tpu.memory_space<vmem>>, vector<128x128xbf16>
    %cst = arith.constant dense<0.000000e+00> : vector<8x128xf32>
    %6 = tpu.matmul %2, %5, %cst {dimension_numbers = #tpu.dot_dimension_numbers<[1], [0], [0], [1], [0, 0, 1, 1], [], []>} : vector<8x128xbf16>, vector<128x128xbf16>, vector<8x128xf32> -> vector<8x128xf32>
    %7 = arith.truncf %6 : vector<8x128xf32> to vector<8x128xbf16>
    %8 = vector.shape_cast %7 : vector<8x128xbf16> to vector<2x4x128xbf16>
    %c0_8 = arith.constant 0 : index
    %c0_9 = arith.constant 0 : index
    %9 = vector.load %arg5[%c0_8, %c0_9] : memref<128x128xbf16, #tpu.memory_space<vmem>>, vector<128x128xbf16>
    %cst_10 = arith.constant dense<0.000000e+00> : vector<8x128xf32>
    %10 = tpu.matmul %2, %9, %cst_10 {dimension_numbers = #tpu.dot_dimension_numbers<[1], [0], [0], [1], [0, 0, 1, 1], [], []>} : vector<8x128xbf16>, vector<128x128xbf16>, vector<8x128xf32> -> vector<8x128xf32>
    %11 = arith.truncf %10 : vector<8x128xf32> to vector<8x128xbf16>
    %12 = vector.shape_cast %11 : vector<8x128xbf16> to vector<2x4x128xbf16>
    %c0_11 = arith.constant 0 : index
    %c0_12 = arith.constant 0 : index
    %13 = vector.load %arg6[%c0_11, %c0_12] : memref<128x128xbf16, #tpu.memory_space<vmem>>, vector<128x128xbf16>
    %cst_13 = arith.constant dense<0.000000e+00> : vector<8x128xf32>
    %14 = tpu.matmul %2, %13, %cst_13 {dimension_numbers = #tpu.dot_dimension_numbers<[1], [0], [0], [1], [0, 0, 1, 1], [], []>} : vector<8x128xbf16>, vector<128x128xbf16>, vector<8x128xf32> -> vector<8x128xf32>
    %15 = arith.truncf %14 : vector<8x128xf32> to vector<8x128xbf16>
    %16 = vector.shape_cast %15 : vector<8x128xbf16> to vector<2x4x128xbf16>
    %17 = vector.extract_strided_slice %8 {offsets = [0, 0, 0], sizes = [2, 4, 32], strides = [1, 1, 1]} : vector<2x4x128xbf16> to vector<2x4x32xbf16>
    %18 = vector.extract_strided_slice %8 {offsets = [0, 0, 32], sizes = [2, 4, 32], strides = [1, 1, 1]} : vector<2x4x128xbf16> to vector<2x4x32xbf16>
    %19 = vector.extract_strided_slice %8 {offsets = [0, 0, 64], sizes = [2, 4, 32], strides = [1, 1, 1]} : vector<2x4x128xbf16> to vector<2x4x32xbf16>
    %20 = vector.extract_strided_slice %8 {offsets = [0, 0, 96], sizes = [2, 4, 32], strides = [1, 1, 1]} : vector<2x4x128xbf16> to vector<2x4x32xbf16>
    %21 = tpu.concatenate %17, %18, %19, %20 in 0 : vector<2x4x32xbf16>, vector<2x4x32xbf16>, vector<2x4x32xbf16>, vector<2x4x32xbf16> -> vector<8x4x32xbf16>
    %22 = vector.extract_strided_slice %12 {offsets = [0, 0, 0], sizes = [2, 4, 32], strides = [1, 1, 1]} : vector<2x4x128xbf16> to vector<2x4x32xbf16>
    %23 = vector.extract_strided_slice %12 {offsets = [0, 0, 32], sizes = [2, 4, 32], strides = [1, 1, 1]} : vector<2x4x128xbf16> to vector<2x4x32xbf16>
    %24 = vector.extract_strided_slice %12 {offsets = [0, 0, 64], sizes = [2, 4, 32], strides = [1, 1, 1]} : vector<2x4x128xbf16> to vector<2x4x32xbf16>
    %25 = vector.extract_strided_slice %12 {offsets = [0, 0, 96], sizes = [2, 4, 32], strides = [1, 1, 1]} : vector<2x4x128xbf16> to vector<2x4x32xbf16>
    %26 = tpu.concatenate %22, %23, %24, %25 in 0 : vector<2x4x32xbf16>, vector<2x4x32xbf16>, vector<2x4x32xbf16>, vector<2x4x32xbf16> -> vector<8x4x32xbf16>
    %27 = vector.extract_strided_slice %16 {offsets = [0, 0, 0], sizes = [2, 4, 32], strides = [1, 1, 1]} : vector<2x4x128xbf16> to vector<2x4x32xbf16>
    %28 = vector.extract_strided_slice %16 {offsets = [0, 0, 32], sizes = [2, 4, 32], strides = [1, 1, 1]} : vector<2x4x128xbf16> to vector<2x4x32xbf16>
    %29 = vector.extract_strided_slice %16 {offsets = [0, 0, 64], sizes = [2, 4, 32], strides = [1, 1, 1]} : vector<2x4x128xbf16> to vector<2x4x32xbf16>
    %30 = vector.extract_strided_slice %16 {offsets = [0, 0, 96], sizes = [2, 4, 32], strides = [1, 1, 1]} : vector<2x4x128xbf16> to vector<2x4x32xbf16>
    %31 = tpu.concatenate %27, %28, %29, %30 in 0 : vector<2x4x32xbf16>, vector<2x4x32xbf16>, vector<2x4x32xbf16>, vector<2x4x32xbf16> -> vector<8x4x32xbf16>
    "tpu.trace_start"() <{level = 10 : i32, message = "bqd,bkd->bqk"}> : () -> ()
    %cst_14 = arith.constant dense<0.000000e+00> : vector<8x4x4xf32>
    %32 = tpu.matmul %21, %26, %cst_14 {dimension_numbers = #tpu.dot_dimension_numbers<[2], [2], [1], [1], [0, 0, 0, 1, 1, 1], [0], [0]>} : vector<8x4x32xbf16>, vector<8x4x32xbf16>, vector<8x4x4xf32> -> vector<8x4x4xf32>
    "tpu.trace_stop"() : () -> ()
    %33 = vector.shape_cast %32 : vector<8x4x4xf32> to vector<4x2x4x4xf32>
    %cst_15 = arith.constant 0.000000e+00 : f32
    %34 = vector.broadcast %cst_15 : f32 to vector<2x4xf32>
    %35 = arith.cmpf oeq, %4, %34 : vector<2x4xf32>
    %36 = vector.shape_cast %35 : vector<2x4xi1> to vector<1x2x1x4xi1>
    %cst_16 = arith.constant -1.000000e+30 : f32
    %37 = vector.shape_cast %36 : vector<1x2x1x4xi1> to vector<1x2x1x4xi1>
    %38 = vector.broadcast %37 : vector<1x2x1x4xi1> to vector<4x2x4x4xi1>
    %39 = vector.broadcast %cst_16 : f32 to vector<4x2x4x4xf32>
    %40 = arith.select %38, %39, %33 : vector<4x2x4x4xi1>, vector<4x2x4x4xf32>
    %cst_17 = arith.constant dense<0xFF800000> : vector<4x2x4xf32>
    %41 = vector.multi_reduction <maximumf>, %40, %cst_17 [3] : vector<4x2x4x4xf32> to vector<4x2x4xf32>
    %42 = vector.shape_cast %41 : vector<4x2x4xf32> to vector<4x2x4x1xf32>
    %43 = vector.broadcast %42 : vector<4x2x4x1xf32> to vector<4x2x4x4xf32>
    %44 = arith.subf %40, %43 : vector<4x2x4x4xf32>
    %45 = math.exp %44 : vector<4x2x4x4xf32>
    %cst_18 = arith.constant dense<0.000000e+00> : vector<4x2x4xf32>
    %46 = vector.multi_reduction <add>, %45, %cst_18 [3] : vector<4x2x4x4xf32> to vector<4x2x4xf32>
    %47 = vector.shape_cast %46 : vector<4x2x4xf32> to vector<4x2x4x1xf32>
    %cst_19 = arith.constant dense<0.000000e+00> : vector<2xf32>
    %48 = vector.multi_reduction <add>, %4, %cst_19 [1] : vector<2x4xf32> to vector<2xf32>
    %49 = vector.shape_cast %48 : vector<2xf32> to vector<2x1xf32>
    %cst_20 = arith.constant 0.000000e+00 : f32
    %50 = vector.broadcast %cst_20 : f32 to vector<2x1xf32>
    %51 = arith.cmpf one, %49, %50 : vector<2x1xf32>
    %52 = arith.extui %51 : vector<2x1xi1> to vector<2x1xi32>
    %53 = arith.sitofp %52 : vector<2x1xi32> to vector<2x1xf32>
    %54 = tpu.reciprocal %47 {approx = true} : vector<4x2x4x1xf32> -> vector<4x2x4x1xf32>
    %55 = vector.shape_cast %53 : vector<2x1xf32> to vector<1x2x1x1xf32>
    %56 = vector.broadcast %55 : vector<1x2x1x1xf32> to vector<4x2x4x1xf32>
    %57 = arith.mulf %54, %56 : vector<4x2x4x1xf32>
    %58 = vector.broadcast %57 : vector<4x2x4x1xf32> to vector<4x2x4x4xf32>
    %59 = arith.mulf %45, %58 : vector<4x2x4x4xf32>
    %60 = arith.truncf %59 : vector<4x2x4x4xf32> to vector<4x2x4x4xbf16>
    %61 = vector.shape_cast %60 : vector<4x2x4x4xbf16> to vector<8x4x4xbf16>
    "tpu.trace_start"() <{level = 10 : i32, message = "bqk,bkd->bqd"}> : () -> ()
    %cst_21 = arith.constant dense<0.000000e+00> : vector<8x4x32xf32>
    %62 = tpu.matmul %61, %31, %cst_21 {dimension_numbers = #tpu.dot_dimension_numbers<[2], [1], [1], [2], [0, 0, 0, 1, 1, 2], [0], [0]>} : vector<8x4x4xbf16>, vector<8x4x32xbf16>, vector<8x4x32xf32> -> vector<8x4x32xf32>
    "tpu.trace_stop"() : () -> ()
    %63 = vector.extract_strided_slice %62 {offsets = [0, 0, 0], sizes = [2, 4, 32], strides = [1, 1, 1]} : vector<8x4x32xf32> to vector<2x4x32xf32>
    %64 = vector.extract_strided_slice %62 {offsets = [2, 0, 0], sizes = [2, 4, 32], strides = [1, 1, 1]} : vector<8x4x32xf32> to vector<2x4x32xf32>
    %65 = vector.extract_strided_slice %62 {offsets = [4, 0, 0], sizes = [2, 4, 32], strides = [1, 1, 1]} : vector<8x4x32xf32> to vector<2x4x32xf32>
    %66 = vector.extract_strided_slice %62 {offsets = [6, 0, 0], sizes = [2, 4, 32], strides = [1, 1, 1]} : vector<8x4x32xf32> to vector<2x4x32xf32>
    %67 = tpu.concatenate %63, %64, %65, %66 in 2 : vector<2x4x32xf32>, vector<2x4x32xf32>, vector<2x4x32xf32>, vector<2x4x32xf32> -> vector<2x4x128xf32>
    %68 = vector.shape_cast %67 : vector<2x4x128xf32> to vector<8x128xf32>
    %69 = arith.truncf %68 : vector<8x128xf32> to vector<8x128xbf16>
    %c0_22 = arith.constant 0 : index
    %c0_23 = arith.constant 0 : index
    %70 = vector.load %arg7[%c0_22, %c0_23] : memref<128x128xbf16, #tpu.memory_space<vmem>>, vector<128x128xbf16>
    %cst_24 = arith.constant dense<0.000000e+00> : vector<8x128xf32>
    %71 = tpu.matmul %69, %70, %cst_24 {dimension_numbers = #tpu.dot_dimension_numbers<[1], [0], [0], [1], [0, 0, 1, 1], [], []>} : vector<8x128xbf16>, vector<128x128xbf16>, vector<8x128xf32> -> vector<8x128xf32>
    %c0_25 = arith.constant 0 : index
    %c0_26 = arith.constant 0 : index
    %72 = vector.load %arg8[%c0_25, %c0_26] : memref<1x128xf32, #tpu.memory_space<vmem>>, vector<1x128xf32>
    %73 = vector.broadcast %72 : vector<1x128xf32> to vector<8x128xf32>
    %74 = arith.addf %71, %73 : vector<8x128xf32>
    %75 = vector.shape_cast %74 : vector<8x128xf32> to vector<2x4x128xf32>
    %76 = arith.truncf %75 : vector<2x4x128xf32> to vector<2x4x128xbf16>
    %c0_27 = arith.constant 0 : index
    %c0_28 = arith.constant 0 : index
    %c0_29 = arith.constant 0 : index
    %77 = vector.load %arg9[%c0_27, %c0_28, %c0_29] : memref<2x4x128xbf16, #tpu.memory_space<vmem>>, vector<2x4x128xbf16>
    tpu.vector_store %arg9[%c0_27, %c0_28, %c0_29], %76 {strides = array<i32>} : memref<2x4x128xbf16, #tpu.memory_space<vmem>>, vector<2x4x128xbf16>,
    return
  }
  func.func @transform_0(%arg0: i32, %arg1: i32) -> (i32, i32, i32) {
    %c0_i32 = arith.constant 0 : i32
    %c0_i32_0 = arith.constant 0 : i32
    return %arg0, %c0_i32, %arg1 : i32, i32, i32
  }
  func.func @transform_1(%arg0: i32, %arg1: i32) -> (i32, i32, i32, i32) {
    %c0_i32 = arith.constant 0 : i32
    %c0_i32_0 = arith.constant 0 : i32
    %c0_i32_1 = arith.constant 0 : i32
    return %arg1, %arg0, %c0_i32, %c0_i32_0 : i32, i32, i32, i32
  }
  func.func @transform_2(%arg0: i32, %arg1: i32) -> (i32, i32) {
    %c0_i32 = arith.constant 0 : i32
    %c0_i32_0 = arith.constant 0 : i32
    %c0_i32_1 = arith.constant 0 : i32
    return %c0_i32, %c0_i32_0 : i32, i32
  }
  func.func @transform_3(%arg0: i32, %arg1: i32) -> (i32, i32) {
    %c0_i32 = arith.constant 0 : i32
    %c0_i32_0 = arith.constant 0 : i32
    %c0_i32_1 = arith.constant 0 : i32
    return %c0_i32, %c0_i32_0 : i32, i32
  }
  func.func @transform_4(%arg0: i32, %arg1: i32) -> (i32, i32) {
    %c0_i32 = arith.constant 0 : i32
    %c0_i32_0 = arith.constant 0 : i32
    %c0_i32_1 = arith.constant 0 : i32
    return %c0_i32, %c0_i32_0 : i32, i32
  }
  func.func @transform_5(%arg0: i32, %arg1: i32) -> (i32, i32) {
    %c0_i32 = arith.constant 0 : i32
    %c0_i32_0 = arith.constant 0 : i32
    %c0_i32_1 = arith.constant 0 : i32
    return %c0_i32, %c0_i32_0 : i32, i32
  }
  func.func @transform_6(%arg0: i32, %arg1: i32) -> (i32, i32) {
    %c0_i32 = arith.constant 0 : i32
    %c0_i32_0 = arith.constant 0 : i32
    %c0_i32_1 = arith.constant 0 : i32
    return %c0_i32, %c0_i32_0 : i32, i32
  }
  func.func @transform_7(%arg0: i32, %arg1: i32) -> (i32, i32, i32) {
    %c0_i32 = arith.constant 0 : i32
    %c0_i32_0 = arith.constant 0 : i32
    return %arg0, %c0_i32, %arg1 : i32, i32, i32
  }
}

</mosaic_0001>

<bundles_post_ra>
// kernel: tpu_custom_call.1
= control target key start
LH: loop header
LB: loop body
LE: loop exit
PB: predicated region body
PF: predicated region fallthrough
CT: control target
= control target key end

     0   :  { %s3405_s0 = inlined_call_operand.hbm [shape: f32[2,4,1024], index: 0, kind: input, shape index: {}]   ;;  %s3406_s1 = inlined_call_operand.vmem [shape: f32[8,2,1,4], index: 1, kind: input, shape index: {}]   ;;  %s3407_s2 = inlined_call_operand.hbm [shape: bf16[128,128], index: 2, kind: input, shape index: {}]   ;;  %s3408_s3 = inlined_call_operand.hbm [shape: bf16[128,128], index: 3, kind: input, shape index: {}]   ;;  %s3409_s4 = inlined_call_operand.hbm [shape: bf16[128,128], index: 4, kind: input, shape index: {}]   ;;  %s3410_s5 = inlined_call_operand.hbm [shape: bf16[128,128], index: 5, kind: input, shape index: {}]   ;;  %s3411_s6 = inlined_call_operand.vmem [shape: f32[1,128], index: 6, kind: input, shape index: {}]   ;;  %s3412_s7 = inlined_call_operand.hbm [shape: bf16[2,4,1024], index: 7, kind: output, shape index: {}]  }
   0x1   :  { %3420 = sst [smem:[#allocation18_spill]] %s3411_s6 }
   0x2   :  { %3421 = sst [smem:[#allocation19_spill]] %s3412_s7 }
   0x3   :  { %12 = vsyncpa [#allocation3], 0 }
   0x4   :  { %14 = vsyncpa [#allocation3 + $0x1], 0 }
   0x5   :  { %15 = vsyncpa [#allocation6], 0 }
   0x6   :  { %16 = vsyncpa [#allocation9], 0 }
   0x7   :  { %17 = vsyncpa [#allocation4], 0 }
   0x8   :  { %19 = vsyncpa [#allocation4 + $0x1], 0  ;;  %s2797_s24 = smov 0   ;;  %s2799_s25 = smov 0  }
   0x9   :  { %s2801_s26 = smov 0   ;;  %s2803_s27 = smov 0  }
   0xa   :  { %s2805_s28 = smov 0   ;;  %s2807_s29 = smov 0  }
   0xb LB: > { %3422 = sst [smem:[#allocation16_spill]] %s2716_s24  ;;  %s2007_s30 = sadd.s32 4294967295, %s2736_s29   ;;  %s2736_s29 = sphi %s2807_s29, %s25_s29   ;;  %s2732_s28 = sphi %s2805_s28, %s3450_s28   ;;  %s2728_s27 = sphi %s2803_s27, %s3449_s27   ;;  %s2724_s26 = sphi %s2801_s26, %s3448_s26   ;;  %s2720_s25 = sphi %s2799_s25, %s3447_s25   ;;  %s2716_s24 = sphi %s2797_s24, %s3446_s24  }
   0xc   : > { %s2008_s8 = sadd.s32 4294967294, %s2736_s29   ;;  %p59_p0 = scmp.ne.s32.totalorder %s2720_s25, %s2716_s24 }
   0xd   : > { %p2831_p1 = scmp.eq.s32.totalorder %s2007_s30, 0  ;;  %p2835_p2 = scmp.eq.s32.totalorder %s2007_s30, 7 }
   0xe   : > { %p224_p3 = scmp.eq.s32.totalorder %s2008_s8, 7  ;;  %p2009_p5 = scmp.ge.s32.totalorder %s2736_s29, 1 }
   0xf   : > { %s3423_s9 = scalar_select %p2831_p1, 1, 0 }
  0x10   : > { %s3424_s10 = scalar_select %p2835_p2, 1, 0 }
  0x11   : > { %p2841_p4 = por %p2831_p1, %p59_p0  ;;  %p2846_p6 = por %p224_p3, %p59_p0 }
  0x12   : > { %p231_p7 = scmp.lt.s32.totalorder %s2736_s29, 9  ;;  %s2738_s14 = smov [#allocation5]  }
  0x13   : > { %s3425_s11 = scalar_select %p2841_p4, 1, 0 }
  0x14   : > { %s3426_s12 = scalar_select %p2846_p6, 1, 0 }
  0x15   : > { %p2851_p8 = pnand %p2009_p5, %p231_p7  ;;  %s243_s15 = sshll.u32 %s2738_s14, 4  ;;  %s2855_s15 = int_to_ptr.vmem [resolvable:$true] %s243_s15 }
  0x16   : > { %3427 = sst [smem:[#allocation17_spill]] %s3426_s12  ;;  %s2739_s17 = smov [#allocation8]  }
  0x17   : > { %s3428_s13 = scalar_select %p2851_p8, 1, 0 }
  0x18   : > { %p2343_p9 = pneg %p2851_p8  ;;  %s269_s18 = sshll.u32 %s2739_s17, 4  ;;  %s2865_s18 = int_to_ptr.vmem [resolvable:$true] %s269_s18 }
  0x19   : > { %s2740_s19 = smov [#allocation7]   ;;  %s2504_s23 = scalar_lea.hbm %s3407_s2, 1024 }
  0x1a   : > { %p2861_p10 = pnand %p2343_p9, %p2831_p1  ;;  %s2867_s20 = sshll.u32 %s2740_s19, 4  ;;  %s257_s20 = int_to_ptr.vmem [resolvable:$true] %s2867_s20 }
  0x1b   : > { %p2505_p11 = scmp.ne.s32.totalorder %s3407_s2, %s2504_s23  ;;  %p2511_p3 = scmp.lt.u32.totalorder %s2504_s23, %s3407_s2 }
  0x1c   : > { %p2877_p12 = pneg %p2861_p10 }
  0x1e   : > { %p2507_p13 = pnand %p2877_p12, %p2505_p11 }
  0x20   : > { %p2508_p0 = pneg %p2507_p13 }
  0x22   : > { %p2513_p5 = pnand %p2511_p3, %p2508_p0 }
  0x24   : > { %2516 = shalt.err (!%p2513_p5)
}
  0x25   : > { %s2517_s21 = scalar_lea.vmem %s2855_s15, 1024  ;;  %p2525_p1 = scmp.lt.s32.totalorder %s2855_s15, %s2855_s15 }
  0x26   : > { %p2518_p7 = scmp.ne.s32.totalorder %s2855_s15, %s2517_s21  ;;  %p2526_p4 = scmp.lt.s32.totalorder %s2517_s21, %s2517_s21 }
  0x28   : > { %p2520_p9 = pnand %p2518_p7, %p2877_p12  ;;  %p2527_p11 = por %p2526_p4, %p2525_p1 }
  0x2a   : > { %p2521_p6 = pneg %p2520_p9 }
  0x2c   : > { %p2528_p13 = pnand %p2527_p11, %p2521_p6 }
  0x2e   : > { %2531 = shalt.err (!%p2528_p13)
}
  0x2f   : > { %s2741_s22 = smov 64   ;;  %s2742_s23 = smov 4  }
  0x30   : > { %2346 = dma.hbm_to_vmem [thread:$0]  (!%p2861_p10), %s3407_s2, 1024, %s2855_s15, [#allocation6], %s2741_s22, %s2741_s22, %s2742_s23  }
  0x31   : > { %s2532_s21 = scalar_lea.hbm %s3409_s4, 1024 }
  0x32   : > { %p2533_p1 = scmp.ne.s32.totalorder %s3409_s4, %s2532_s21  ;;  %p2539_p0 = scmp.lt.u32.totalorder %s2532_s21, %s3409_s4 }
  0x34   : > { %p2535_p4 = pnand %p2533_p1, %p2877_p12 }
  0x36   : > { %p2536_p6 = pneg %p2535_p4 }
  0x38   : > { %p2541_p3 = pnand %p2539_p0, %p2536_p6 }
  0x3a   : > { %2544 = shalt.err (!%p2541_p3)
}
  0x3b   : > { %s2545_s15 = scalar_lea.vmem %s2865_s18, 1024  ;;  %p2553_p11 = scmp.lt.s32.totalorder %s2865_s18, %s2865_s18 }
  0x3c   : > { %p2546_p5 = scmp.ne.s32.totalorder %s2865_s18, %s2545_s15  ;;  %p2554_p13 = scmp.lt.s32.totalorder %s2545_s15, %s2545_s15 }
  0x3e   : > { %p2548_p7 = pnand %p2546_p5, %p2877_p12  ;;  %p2555_p1 = por %p2554_p13, %p2553_p11 }
  0x40   : > { %p2549_p9 = pneg %p2548_p7 }
  0x42   : > { %p2556_p4 = pnand %p2555_p1, %p2549_p9 }
  0x44   : > { %2559 = shalt.err (!%p2556_p4)
}
  0x45   : > { %2352 = dma.hbm_to_vmem [thread:$0]  (!%p2861_p10), %s3409_s4, 1024, %s2865_s18, [#allocation9], %s2741_s22, %s2741_s22, %s2742_s23  }
  0x46   : > { %s2560_s30 = scalar_lea.hbm %s3408_s3, 1024 }
  0x47   : > { %p2561_p6 = scmp.ne.s32.totalorder %s3408_s3, %s2560_s30  ;;  %p2567_p5 = scmp.lt.u32.totalorder %s2560_s30, %s3408_s3 }
  0x49   : > { %p2563_p0 = pnand %p2561_p6, %p2877_p12 }
  0x4b   : > { %p2564_p3 = pneg %p2563_p0 }
  0x4d   : > { %p2569_p7 = pnand %p2567_p5, %p2564_p3 }
  0x4f   : > { %2572 = shalt.err (!%p2569_p7)
}
  0x50   : > { %s2573_s15 = scalar_lea.vmem %s257_s20, 1024  ;;  %p2581_p1 = scmp.lt.s32.totalorder %s257_s20, %s257_s20 }
  0x51   : > { %p2574_p9 = scmp.ne.s32.totalorder %s257_s20, %s2573_s15  ;;  %p2582_p4 = scmp.lt.s32.totalorder %s2573_s15, %s2573_s15 }
  0x53   : > { %p2576_p11 = pnand %p2574_p9, %p2877_p12  ;;  %p2583_p8 = por %p2582_p4, %p2581_p1 }
  0x55   : > { %p2577_p13 = pneg %p2576_p11 }
  0x57   : > { %p2584_p2 = pnand %p2583_p8, %p2577_p13 }
  0x59   : > { %2587 = shalt.err (!%p2584_p2)
}
  0x5a   : > { %2349 = dma.hbm_to_vmem [thread:$0]  (!%p2861_p10), %s3408_s3, 1024, %s257_s20, [#allocation6], %s2741_s22, %s2741_s22, %s2742_s23  }
  0x5b   : > { %s2743_s7 = smov [#allocation10]   ;;  %s2588_s8 = scalar_lea.hbm %s3410_s5, 1024 }
  0x5c   : > { %s282_s24 = sshll.u32 %s2743_s7, 4  ;;  %p2589_p2 = scmp.ne.s32.totalorder %s3410_s5, %s2588_s8  ;;  %s283_s24 = int_to_ptr.vmem [resolvable:$true] %s282_s24 }
  0x5d   : > { %p2595_p0 = scmp.lt.u32.totalorder %s2588_s8, %s3410_s5 }
  0x5e   : > { %p2591_p8 = pnand %p2589_p2, %p2877_p12 }
  0x60   : > { %p2592_p6 = pneg %p2591_p8 }
  0x62   : > { %p2597_p3 = pnand %p2595_p0, %p2592_p6 }
  0x64   : > { %2600 = shalt.err (!%p2597_p3)
}
  0x65   : > { %s2601_s20 = scalar_lea.vmem %s283_s24, 1024  ;;  %p2609_p11 = scmp.lt.s32.totalorder %s283_s24, %s283_s24 }
  0x66   : > { %p2602_p5 = scmp.ne.s32.totalorder %s283_s24, %s2601_s20  ;;  %p2610_p13 = scmp.lt.s32.totalorder %s2601_s20, %s2601_s20 }
  0x68   : > { %p2604_p7 = pnand %p2602_p5, %p2877_p12  ;;  %p2611_p1 = por %p2610_p13, %p2609_p11 }
  0x6a   : > { %p2605_p9 = pneg %p2604_p7 }
  0x6c   : > { %p2612_p4 = pnand %p2611_p1, %p2605_p9 }
  0x6e   : > { %2615 = shalt.err (!%p2612_p4)
}
  0x6f   : > { %2355 = dma.hbm_to_vmem [thread:$0]  (!%p2861_p10), %s3410_s5, 1024, %s283_s24, [#allocation9], %s2741_s22, %s2741_s22, %s2742_s23  }
  0x70   : > { %s34_s14 = sadd.s32 1, %s2732_s28  ;;  %s46_s16 = sadd.s32 1, %s2724_s26 }
  0x71   : > { %p35_p12 = scmp.ge.s32.totalorder %s34_s14, 8  ;;  %p53_p2 = scmp.ne.s32.totalorder %s2724_s26, %s2720_s25 }
  0x72   : > { %p54_p8 = scmp.eq.s32.totalorder %s2736_s29, 0  ;;  %p2368_p6 = scmp.lt.s32.totalorder %s2736_s29, 8 }
  0x73   : > { %s3452_s14 = smov (%p35_p12, %s34_s14), 0  ;;  %p3431_p3 = scmp.ne.s32.totalorder %s3424_s10, 0 }
  0x74   : > { %p55_p0 = por %p54_p8, %p53_p2  ;;  %s42_s12 = ssub.s32 %s2732_s28, %s3452_s14 }
  0x75   : > { %p2980_p5 = por %p3431_p3, %p53_p2  ;;  %s299_s30 = sand.u32 1, %s2724_s26  }
  0x76   : > { %p44_p7 = scmp.eq.s32.totalorder %s42_s12, 0  ;;  %s2015_s24 = sshll.u32 %s299_s30, 3 }
  0x77   : > { %s2016_s8 = sshll.u32 %s2732_s28, 6  ;;  %s303_s10 = scalar_lea.vmem [#allocation2], %s2015_s24 }
  0x78   : > { %s2989_s17 = scalar_select %p44_p7, %s2724_s26, %s46_s16  }
  0x79   : > { %s2994_s15 = scalar_lea.hbm %s3405_s0, %s2016_s8  ;;  %s312_s20 = sshll.u32 %s303_s10, 4  ;;  %s3002_s20 = int_to_ptr.vmem [resolvable:$true] %s312_s20 }
  0x7a   : > { %p2998_p10 = pnand %p2368_p6, %p55_p0  ;;  %s3004_s6 = scalar_lea.sflag [#allocation3], %s299_s30 }
  0x7b   : > { %s2616_s16 = scalar_lea.hbm %s2994_s15, 128  ;;  %s2621_s8 = scalar_lea.hbm %s3405_s0, 1024 }
  0x7c   : > { %p2617_p9 = scmp.ne.s32.totalorder %s2994_s15, %s2616_s16  ;;  %p2618_p11 = pneg %p2998_p10 }
  0x7d   : > { %p2622_p4 = scmp.lt.u32.totalorder %s2994_s15, %s3405_s0  ;;  %p2623_p12 = scmp.lt.u32.totalorder %s2621_s8, %s2616_s16 }
  0x7e   : > { %p2619_p13 = pnand %p2618_p11, %p2617_p9  ;;  %p2625_p8 = scmp.lt.u32.totalorder %s2616_s16, %s2994_s15 }
  0x7f   : > { %p2624_p2 = por %p2623_p12, %p2622_p4 }
  0x80   : > { %p2620_p1 = pneg %p2619_p13 }
  0x81   : > { %p2626_p6 = por %p2625_p8, %p2624_p2 }
  0x83   : > { %p2627_p0 = pnand %p2626_p6, %p2620_p1 }
  0x85   : > { %2630 = shalt.err (!%p2627_p0)
}
  0x86   : > { %s2631_s30 = scalar_lea.vmem %s3002_s20, 128  ;;  %s2744_s10 = smov [#allocation2]  }
  0x87   : > { %p2632_p3 = scmp.ne.s32.totalorder %s3002_s20, %s2631_s30  ;;  %s2636_s12 = sshll.u32 %s2744_s10, 4  ;;  %s2637_s12 = int_to_ptr.vmem [resolvable:$false] %s2636_s12 }
  0x88   : > { %s2638_s24 = scalar_lea.vmem %s2637_s12, 256  ;;  %p2639_p13 = scmp.lt.s32.totalorder %s3002_s20, %s2637_s12 }
  0x89   : > { %p2634_p7 = pnand %p2632_p3, %p2618_p11  ;;  %p2640_p4 = scmp.lt.s32.totalorder %s2638_s24, %s2631_s30 }
  0x8b   : > { %p2635_p9 = pneg %p2634_p7  ;;  %p2641_p12 = por %p2640_p4, %p2639_p13 }
  0x8d   : > { %p2642_p2 = pnand %p2641_p12, %p2635_p9 }
  0x8f   : > { %2645 = shalt.err (!%p2642_p2)
}
  0x90   : > { %s2745_s16 = smov 512   ;;  %p3434_p11 = scmp.ne.s32.totalorder %s3428_s13, 0 }
  0x91   : > { %2359 = dma.hbm_to_vmem [thread:$0]  (!%p2998_p10), %s2994_s15, 128, %s3002_s20, %s3004_s6, %s2745_s16, %s2741_s22, %s2742_s23  }
  0x92   : > { %336 = sbr.rel (%p3434_p11) target bundleno = 1689 (0x699), region = 48  ;;  %s3037_s8 = sand.u32 (!%p3434_p11), 1, %s2720_s25  }
  0x93   : > { %s2018_s19 = sshll.u32 (!%p3434_p11), %s3037_s8, 3  ;;  %s339_s21 = scalar_lea.sflag (!%p3434_p11), [#allocation3], %s3037_s8 }
  0x94   : > { %s3041_s30 = scalar_lea.vmem (!%p3434_p11), [#allocation2], %s2018_s19  ;;  %p3435_p1 = scmp.ne.s32.totalorder (!%p3434_p11), %s3425_s11, 0 }
  0x99   : > { %2699 = dma.done.wait (%p3435_p1), %s339_s21, 128  }
  0x9a   : > { %2701 = vsyncadd (%p3435_p1), %s339_s21, 4294967168  ;;  %p3436_p10 = scmp.ne.s32.totalorder %s3423_s9, 0 }
  0x9c   : > { %2703 = dma.done.wait (%p3436_p10), [#allocation6], 2048  }
  0x9d   : > { %2705 = vsyncadd (%p3436_p10), [#allocation6], 4294965248 }
  0x9e   : > { %2707 = dma.done.wait (%p3436_p10), [#allocation9], 2048  }
  0x9f   : > { %2709 = vsyncadd (%p3436_p10), [#allocation9], 4294965248  ;;  %v2746_v0 = vmov 0.0   ;;  %vm2747_vm0 = vmmov 0   ;;  %v2439_v1 = vld [vmem:[#allocation7] sm:$0xff]   ;;  %v2441_v3 = vld [vmem:[#allocation7 + $0x8] sm:$0xff]   ;;  %v527_v21 = vlaneseq }
  0xa0   : > { %2167 = vmatprep.subr.bf16.mxu1 %v2746_v0  ;;  %2147 = vmatprep.subr.bf16.mxu0 %v2746_v0  ;;  %v2440_v2 = vld [vmem:[#allocation5] sm:$0xff]   ;;  %v2442_v4 = vld [vmem:[#allocation5 + $0x8] sm:$0xff]   ;;  %v2443_v5 = vld [vmem:[#allocation7 + $0x10] sm:$0xff]   ;;  %v2748_v19 = vmov 1983009808   ;;  %vm796_vm1 = vcmask 261120  }
  0xa1   : > { %2183 = vmatprep.mubr.msk.bf16.mxu1 %vm2747_vm0, %v2746_v0  ;;  %2163 = vmatprep.mubr.msk.bf16.mxu0 %vm2747_vm0, %v2746_v0  ;;  %v2444_v6 = vld [vmem:[#allocation5 + $0x10] sm:$0xff]   ;;  %v2445_v7 = vld [vmem:[#allocation7 + $0x18] sm:$0xff]   ;;  %v2447_v9 = vld [vmem:[#allocation7 + $0x20] sm:$0xff]   ;;  %v525_v20 = vunpack.c.l.s4 %v2748_v19  ;;  %v3086_v23 = vshrl.u32 %v527_v21, 7  ;;  %s2749_s9 = smov 96   ;;  %s2750_s11 = smov 64  }
  0xa2   : > { %2168 = vmatpush3.bf16.msra.mxu1 %v2439_v1  ;;  %2148 = vmatpush3.bf16.msra.mxu0 %v2440_v2  ;;  %v2446_v8 = vld [vmem:[#allocation5 + $0x18] sm:$0xff]   ;;  %v2448_v10 = vld [vmem:[#allocation5 + $0x20] sm:$0xff]   ;;  %v2449_v11 = vld [vmem:[#allocation7 + $0x28] sm:$0xff]   ;;  %s2751_s13 = smov 32   ;;  %p399_p8 = scmp.lt.s32.totalorder %s2728_s27, 7  ;;  %vm1278_vm2 = vcmask 25600  }
  0xa3   : > { %2169 = vmatprep.subr.bf16.mxu1 %v2746_v0  ;;  %2149 = vmatprep.subr.bf16.mxu0 %v2746_v0  ;;  %v2450_v12 = vld [vmem:[#allocation5 + $0x28] sm:$0xff]   ;;  %v2451_v13 = vld [vmem:[#allocation7 + $0x30] sm:$0xff]   ;;  %v2453_v16 = vld [vmem:[#allocation7 + $0x38] sm:$0xff]   ;;  %v526_v22 = vunpack.c.0.s8 %v525_v20  ;;  %v2752_v49 = vmov 1966171168   ;;  %vm1187_vm6 = vcmask 27648  }
  0xa4   : > { %v2452_v14 = vld [vmem:[#allocation5 + $0x30] sm:$0xff]   ;;  %v2455_v17 = vld [vmem:[#allocation5 + $0x38] sm:$0xff]   ;;  %v2456_v40 = vld [vmem:[#allocation8] sm:$0xff]   ;;  %s400_s22 = scalar_select %p399_p8, %s2728_s27, 7  ;;  %v1264_v50 = vunpack.c.l.s4 %v2752_v49  ;;  %vm1332_vm8 = vcmask 1041408   ;;  %vm1328_vm10 = vcmask 31744  }
  0xa5   : > { %v2454_v15 = vld [vmem:[%s3041_s30] sm:$0xff]   ;;  %v3089_v24 = vsub.s32 %v526_v22, %v3086_v23  ;;  %v2457_v42 = vld [vmem:[#allocation8 + $0x8] sm:$0xff]   ;;  %v2460_v45 = vld [vmem:[#allocation8 + $0x20] sm:$0xff]   ;;  %vm1724_vm11 = vcmask 523264   ;;  %vm1727_vm12 = vcmask 785408   ;;  %s2023_s6 = sshll.u32 %s3037_s8, 2 }
  0xa6   : > { %2170 = vmatpush3.bf16.msra.mxu1 %v2441_v3  ;;  %2150 = vmatpush3.bf16.msra.mxu0 %v2442_v4  ;;  %v3076_v18 = vpack.c.bf16 %v2454_v15, %v2454_v15  ;;  %v2458_v43 = vld [vmem:[#allocation8 + $0x10] sm:$0xff]   ;;  %v2459_v44 = vld [vmem:[#allocation8 + $0x18] sm:$0xff]   ;;  %v2461_v46 = vld [vmem:[#allocation8 + $0x28] sm:$0xff]   ;;  %s2024_s23 = sshll.u32 %s400_s22, 1  ;;  %v1265_v51 = vunpack.c.0.s8 %v1264_v50  ;;  %v2753_v15 = vmov 0   ;;  %s3441_s24 = sld [smem:[#allocation18_spill]] }
  0xa7   : > { %2171 = vmatprep.subr.bf16.mxu1 %v2746_v0  ;;  %2151 = vmatprep.subr.bf16.mxu0 %v2746_v0  ;;  %v2462_v47 = vld [vmem:[#allocation8 + $0x30] sm:$0xff]   ;;  %v2463_v48 = vld [vmem:[#allocation8 + $0x38] sm:$0xff]   ;;  %s405_s18 = scalar_lea.vmem %s3406_s1, %s2024_s23  ;;  %s396_s16 = scalar_lea.vmem [#allocation11], %s2023_s6 }
  0xa8   : > { %v416_v52 = vld [vmem:[%s405_s18] sm:$0x1]  ;;  %v417_v53 = vld [vmem:[%s405_s18 + $0x1] sm:$0x1]  ;;  %v1268_v55 = vsub.s32 %v1265_v51, %v3086_v23  ;;  %s1869_s19 = sshll.u32 %s396_s16, 4  ;;  %s2076_s21 = sshll.u32 %s2728_s27, 5  ;;  %s3351_s19 = int_to_ptr.vmem [resolvable:$true] %s1869_s19 }
  0xa9   : > { %v1262_v54 = vcombine.low %v416_v52, %v417_v53  ;;  %vm1165_vm3 = vcmp.eq.f32.partialorder %v416_v52, 0.0  ;;  %vm1166_vm4 = vcmp.eq.f32.partialorder %v417_v53, 0.0  ;;  %s1854_s23 = scalar_lea.sflag [#allocation4], %s3037_s8  ;;  %s2646_s15 = scalar_lea.vmem %s3351_s19, 64 }
  0xaa   : > { %2172 = vmatpush3.bf16.msra.mxu1 %v2443_v5  ;;  %2152 = vmatpush3.bf16.msra.mxu0 %v2444_v6  ;;  %v1168_v19 = vsel %vm1166_vm4, 1, %v2753_v15  ;;  %p2647_p6 = scmp.ne.s32.totalorder %s3351_s19, %s2646_s15  ;;  %s2754_s27 = smov [#allocation11]  }
  0xab   : > { %2173 = vmatprep.subr.bf16.mxu1 %v2746_v0  ;;  %2153 = vmatprep.subr.bf16.mxu0 %v2746_v0  ;;  %v1269_v56 = vrot.slane %v1262_v54, %v1268_v55  ;;  %s2650_s20 = sshll.u32 %s2754_s27, 4  ;;  %s2651_s20 = int_to_ptr.vmem [resolvable:$false] %s2650_s20 }
  0xac   : > { %p2648_p0 = pnand %p2647_p6, %p2980_p5  ;;  %s2652_s18 = scalar_lea.vmem %s2651_s20, 128 }
  0xad   : > { %v1276_v57 = vrot.slane %v1269_v56, %v1268_v55  ;;  %p2653_p7 = scmp.lt.s32.totalorder %s3351_s19, %s2651_s20  ;;  %p2654_p9 = scmp.lt.s32.totalorder %s2652_s18, %s2646_s15 }
  0xae   : > { %2174 = vmatpush3.bf16.msra.mxu1 %v2445_v7  ;;  %2154 = vmatpush3.bf16.msra.mxu0 %v2446_v8  ;;  %p2649_p3 = pneg %p2648_p0 }
  0xaf   : > { %2175 = vmatprep.subr.bf16.mxu1 %v2746_v0  ;;  %2155 = vmatprep.subr.bf16.mxu0 %v2746_v0  ;;  %v1279_v58 = vsel %vm1278_vm2, %v1276_v57, 0.0  ;;  %p2655_p13 = por %p2654_p9, %p2653_p7 }
  0xb1   : > { %p2656_p4 = pnand %p2655_p13, %p2649_p3 }
  0xb2   : > { %2176 = vmatpush3.bf16.msra.mxu1 %v2447_v9  ;;  %2156 = vmatpush3.bf16.msra.mxu0 %v2448_v10 }
  0xb3   : > { %2177 = vmatprep.subr.bf16.mxu1 %v2746_v0  ;;  %2157 = vmatprep.subr.bf16.mxu0 %v2746_v0 }
  0xb6   : > { %2178 = vmatpush3.bf16.msra.mxu1 %v2449_v11  ;;  %2158 = vmatpush3.bf16.msra.mxu0 %v2450_v12 }
  0xb7   : > { %2179 = vmatprep.subr.bf16.mxu1 %v2746_v0  ;;  %2159 = vmatprep.subr.bf16.mxu0 %v2746_v0 }
  0xba   : > { %2180 = vmatpush3.bf16.msra.mxu1 %v2451_v13  ;;  %2160 = vmatpush3.bf16.msra.mxu0 %v2452_v14  ;;  %v3163_v14 = vsub.s32 0, %v3086_v23 }
  0xbb   : > { %2181 = vmatprep.subr.bf16.mxu1 %v2746_v0  ;;  %2161 = vmatprep.subr.bf16.mxu0 %v2746_v0 }
  0xbe   : > { %2182 = vmatpush3.bf16.msra.mxu1 %v2453_v16  ;;  %2162 = vmatpush3.bf16.msra.mxu0 %v2455_v17  ;;  %v1167_v16 = vsel %vm1165_vm3, 1, %v2753_v15 }
  0xbf   : > { %2207 = vmatprep.subr.bf16.mxu1 %v2746_v0  ;;  %2187 = vmatprep.subr.bf16.mxu0 %v2746_v0  ;;  %v1172_v17 = vrot.slane %v1167_v16, %v3163_v14 }
  0xc1   : > { %2184 = vmatmul.mubr.bf16.vlgmr.msra.gmra.mrb[0].mxu1 %v3076_v18  ;;  %2164 = vmatmul.mubr.bf16.vlgmr.msra.gmra.mrb[0].mxu0 %v3076_v18  ;;  %vm3166_vm5 = vcmp.eq.s32.totalorder %v1172_v17, 1 }
  0xc2   : > { %2209 = vmatprep.mubr.msk.bf16.mxu1 %vm2747_vm0, %v2746_v0  ;;  %2203 = vmatprep.mubr.msk.bf16.mxu0 %vm2747_vm0, %v2746_v0 }
  0xc3   : > { %2188 = vmatpush3.bf16.msra.mxu0 %v2456_v40 }
  0xc4   : > { %2189 = vmatprep.subr.bf16.mxu0 %v2746_v0 }
  0xc7   : > { %2190 = vmatpush3.bf16.msra.mxu0 %v2457_v42 }
  0xc8   : > { %2191 = vmatprep.subr.bf16.mxu0 %v2746_v0 }
  0xcb   : > { %2192 = vmatpush3.bf16.msra.mxu0 %v2458_v43 }
  0xcc   : > { %2193 = vmatprep.subr.bf16.mxu0 %v2746_v0 }
  0xcf   : > { %2194 = vmatpush3.bf16.msra.mxu0 %v2459_v44 }
  0xd0   : > { %2195 = vmatprep.subr.bf16.mxu0 %v2746_v0 }
  0xd3   : > { %2196 = vmatpush3.bf16.msra.mxu0 %v2460_v45 }
  0xd4   : > { %2197 = vmatprep.subr.bf16.mxu0 %v2746_v0 }
  0xd7   : > { %2198 = vmatpush3.bf16.msra.mxu0 %v2461_v46 }
  0xd8   : > { %2199 = vmatprep.subr.bf16.mxu0 %v2746_v0 }
  0xdb   : > { %2200 = vmatpush3.bf16.msra.mxu0 %v2462_v47 }
  0xdc   : > { %2201 = vmatprep.subr.bf16.mxu0 %v2746_v0 }
  0xdf   : > { %2202 = vmatpush3.bf16.msra.mxu0 %v2463_v48 }
  0xe0   : > { %2255 = vmatprep.subr.bf16.mxu0 %v2746_v0 }
  0xe2   : > { %2204 = vmatmul.mubr.bf16.vlgmr.msra.gmra.mrb[4].mxu0 %v3076_v18 }
  0xe3   : > { %2257 = vmatprep.mubr.msk.bf16.mxu0 %vm2747_vm0, %v2746_v0 }
 0x194   : > { %v630_v25 = vpop.f32.mrb[0].mxu1  ;;  %v516_v28 = vpop.f32.mrb[0].mxu0 }
 0x195   : > { %v636_v26 = vpack.c.bf16 %v630_v25, %v630_v25  ;;  %v2185_v27 = vpop.f32.mrb[1].mxu1  ;;  %v522_v30 = vpack.c.bf16 %v516_v28, %v516_v28  ;;  %v2165_v31 = vpop.f32.mrb[1].mxu0 }
 0x196   : > { %v633_v29 = vpop.f32.mrb[2].mxu1  ;;  %v519_v34 = vpop.f32.mrb[2].mxu0  ;;  %v1176_v27 = vrot.slane %v1168_v19, %v3163_v14 }
 0x197   : > { %v644_v32 = vrot.slane %v636_v26, %v3089_v24  ;;  %v2186_v33 = vpop.f32.mrb[3].mxu1  ;;  %v530_v35 = vrot.slane %v522_v30, %v3089_v24  ;;  %v2166_v36 = vpop.f32.mrb[3].mxu0 }
 0x198   : > { %vm3177_vm7 = vcmp.eq.s32.totalorder %v1176_v27, 1 }
 0x199   : > { %772 = vrot.lane.b32.xlu0 %v644_v32, %s2749_s9  ;;  %v801_v37 = vsel %vm796_vm1, %v644_v32, 0  ;;  %v645_v38 = vcombine.high %v644_v32, %v644_v32  ;;  %v531_v39 = vcombine.high %v530_v35, %v530_v35 }
 0x19a   : > { %2208 = vmatpush3.bf16.xpose.msra.mxu1 %v801_v37 }
 0x19b   : > { %774 = vrot.lane.b32.xlu1 %v645_v38, %s2749_s9  ;;  %2213 = vmatprep.subr.bf16.mxu1 %v2746_v0  ;;  %v847_v41 = vsel %vm796_vm1, %v645_v38, 0 }
 0x19d   : > { %760 = vrot.lane.b32.xlu0 %v530_v35, %s2749_s9 }
 0x19f   : > { %762 = vrot.lane.b32.xlu1 %v531_v39, %s2749_s9 }
 0x1a1   : > { %776 = vrot.lane.b32.xlu0 %v644_v32, %s2750_s11  ;;  %2210 = vmatmul.mubr.msk.bf16.vlgmr.msra.gmra.mrb[4].mxu1 %vm796_vm1, %v530_v35 }
 0x1a2   : > { %2214 = vmatpush3.bf16.xpose.msra.mxu1 %v847_v41  ;;  %2215 = vmatprep.mubr.msk.bf16.mxu1 %vm2747_vm0, %v2746_v0 }
 0x1a3   : > { %764 = vrot.lane.b32.xlu1 %v530_v35, %s2750_s11  ;;  %2219 = vmatprep.subr.bf16.mxu1 %v2746_v0 }
 0x1a5   : > { %778 = vrot.lane.b32.xlu0 %v645_v38, %s2750_s11 }
 0x1a7   : > { %766 = vrot.lane.b32.xlu1 %v531_v39, %s2750_s11 }
 0x1a9   : > { %780 = vrot.lane.b32.xlu0 %v644_v32, %s2751_s13  ;;  %2216 = vmatmul.mubr.msk.bf16.vlgmr.msra.gmra.mrb[8].mxu1 %vm796_vm1, %v531_v39 }
 0x1aa   : > { %2221 = vmatprep.mubr.msk.bf16.mxu1 %vm2747_vm0, %v2746_v0 }
 0x1ab   : > { %768 = vrot.lane.b32.xlu1 %v530_v35, %s2751_s13 }
 0x1ad   : > { %782 = vrot.lane.b32.xlu0 %v645_v38, %s2751_s13 }
 0x1af   : > { %770 = vrot.lane.b32.xlu1 %v531_v39, %s2751_s13 }
 0x1b5   : > { %v744_v36 = vpop.f32.mrb[4].mxu0 }
 0x1b6   : > { %v2205_v37 = vpop.f32.mrb[5].mxu0  ;;  %v750_v40 = vpack.c.bf16 %v744_v36, %v744_v36 }
 0x1b7   : > { %v747_v38 = vpop.f32.mrb[6].mxu0 }
 0x1b8   : > { %v2206_v39 = vpop.f32.mrb[7].mxu0  ;;  %v3188_v41 = vrot.slane %v750_v40, %v3089_v24 }
 0x1ba   : > { %v3192_v42 = vcombine.high %v3188_v41, %v3188_v41  ;;  %v1334_v43 = vsel %vm1332_vm8, %v3188_v41, 0 }
 0x1bb   : > { %2256 = vmatpush3.bf16.msra.mxu0 %v1334_v43 }
 0x1bc   : > { %v1380_v44 = vsel %vm1332_vm8, %v3192_v42, 0  ;;  %2267 = vmatprep.subr.bf16.mxu0 %v2746_v0 }
 0x1d3   : > { %1280 = vadd.xlane.f32.xlu1 %v1279_v58 }
 0x20b   : > { %v773_v59 = vpop.permute.xlu0 %772 }
 0x20c   : > { %v893_v60 = vsel %vm796_vm1, %v773_v59, 0 }
 0x20d   : > { %2220 = vmatpush3.bf16.xpose.msra.mxu1 %v893_v60  ;;  %v775_v61 = vpop.permute.xlu1 %774 }
 0x20e   : > { %2225 = vmatprep.subr.bf16.mxu1 %v2746_v0  ;;  %v939_v63 = vsel %vm796_vm1, %v775_v61, 0 }
 0x20f   : > { %v761_v62 = vpop.permute.xlu0 %760 }
 0x211   : > { %v763_v2 = vpop.permute.xlu1 %762 }
 0x213   : > { %v777_v1 = vpop.permute.xlu0 %776 }
 0x214   : > { %2222 = vmatmul.mubr.msk.bf16.vlgmr.msra.gmra.mrb[12].mxu1 %vm796_vm1, %v761_v62  ;;  %v985_v3 = vsel %vm796_vm1, %v777_v1, 0 }
 0x215   : > { %2226 = vmatpush3.bf16.xpose.msra.mxu1 %v939_v63  ;;  %2227 = vmatprep.mubr.msk.bf16.mxu1 %vm2747_vm0, %v2746_v0  ;;  %v765_v5 = vpop.permute.xlu1 %764 }
 0x216   : > { %2231 = vmatprep.subr.bf16.mxu1 %v2746_v0 }
 0x217   : > { %v779_v4 = vpop.permute.xlu0 %778 }
 0x218   : > { %v1031_v6 = vsel %vm796_vm1, %v779_v4, 0 }
 0x219   : > { %v767_v8 = vpop.permute.xlu1 %766 }
 0x21b   : > { %v781_v7 = vpop.permute.xlu0 %780 }
 0x21c   : > { %2228 = vmatmul.mubr.msk.bf16.vlgmr.msra.gmra.mrb[16].mxu1 %vm796_vm1, %v763_v2  ;;  %v1077_v9 = vsel %vm796_vm1, %v781_v7, 0 }
 0x21d   : > { %2232 = vmatpush3.bf16.xpose.msra.mxu1 %v985_v3  ;;  %2233 = vmatprep.mubr.msk.bf16.mxu1 %vm2747_vm0, %v2746_v0  ;;  %v769_v11 = vpop.permute.xlu1 %768 }
 0x21e   : > { %2237 = vmatprep.subr.bf16.mxu1 %v2746_v0 }
 0x21f   : > { %v783_v10 = vpop.permute.xlu0 %782 }
 0x220   : > { %v1123_v12 = vsel %vm796_vm1, %v783_v10, 0 }
 0x221   : > { %v771_v13 = vpop.permute.xlu1 %770 }
 0x224   : > { %2234 = vmatmul.mubr.msk.bf16.vlgmr.msra.gmra.mrb[20].mxu1 %vm796_vm1, %v765_v5 }
 0x225   : > { %2238 = vmatpush3.bf16.xpose.msra.mxu1 %v1031_v6  ;;  %2239 = vmatprep.mubr.msk.bf16.mxu1 %vm2747_vm0, %v2746_v0 }
 0x226   : > { %2243 = vmatprep.subr.bf16.mxu1 %v2746_v0 }
 0x22c   : > { %2240 = vmatmul.mubr.msk.bf16.vlgmr.msra.gmra.mrb[24].mxu1 %vm796_vm1, %v767_v8 }
 0x22d   : > { %2244 = vmatpush3.bf16.xpose.msra.mxu1 %v1077_v9  ;;  %2245 = vmatprep.mubr.msk.bf16.mxu1 %vm2747_vm0, %v2746_v0 }
 0x22e   : > { %2249 = vmatprep.subr.bf16.mxu1 %v2746_v0 }
 0x234   : > { %2246 = vmatmul.mubr.msk.bf16.vlgmr.msra.gmra.mrb[28].mxu1 %vm796_vm1, %v769_v11 }
 0x235   : > { %2250 = vmatpush3.bf16.xpose.msra.mxu1 %v1123_v12  ;;  %2251 = vmatprep.mubr.msk.bf16.mxu1 %vm2747_vm0, %v2746_v0 }
 0x236   : > { %2261 = vmatprep.subr.bf16.mxu1 %v2746_v0 }
 0x23c   : > { %2252 = vmatmul.mubr.msk.bf16.vlgmr.msra.gmra.mrb[32].mxu1 %vm796_vm1, %v771_v13 }
 0x23d   : > { %2263 = vmatprep.mubr.msk.bf16.mxu1 %vm2747_vm0, %v2746_v0  ;;  %2262 = vmatpush3.bf16.msra.mxu1 %v1380_v44 }
 0x23e   : > { %2273 = vmatprep.subr.bf16.mxu1 %v2746_v0 }
 0x260   : > { %v3226_v19 = vpop.xlane.xlu1 %1280 }
 0x261   : > { %vm1282_vm9 = vcmp.ne.f32.partialorder %v3226_v19, 0.0 }
 0x274   : > { %v837_v20 = vpop.f32.mrb[4].mxu1 }
 0x275   : > { %v3172_v21 = vsel %vm3166_vm5, -1e+30, %v837_v20  ;;  %v2211_v22 = vpop.f32.mrb[5].mxu1 }
 0x276   : > { %v840_v25 = vpop.f32.mrb[6].mxu1  ;;  %v1188_v26 = vsel %vm1187_vm6, %v3172_v21, -inf }
 0x277   : > { %1189 = vmax.xlane.f32.xlu0 %v1188_v26  ;;  %v2212_v28 = vpop.f32.mrb[7].mxu1 }
 0x27c   : > { %v883_v30 = vpop.f32.mrb[8].mxu1 }
 0x27d   : > { %v3183_v31 = vsel %vm3177_vm7, -1e+30, %v883_v30  ;;  %v2217_v32 = vpop.f32.mrb[9].mxu1 }
 0x27e   : > { %v886_v33 = vpop.f32.mrb[10].mxu1  ;;  %v1191_v34 = vsel %vm1187_vm6, %v3183_v31, -inf }
 0x27f   : > { %1192 = vmax.xlane.f32.xlu1 %v1191_v34  ;;  %v2218_v35 = vpop.f32.mrb[11].mxu1 }
 0x2e7   : > { %v929_v45 = vpop.f32.mrb[12].mxu1 }
 0x2e8   : > { %v1181_v24 = vsel %vm3166_vm5, -1e+30, %v929_v45  ;;  %v2223_v46 = vpop.f32.mrb[13].mxu1 }
 0x2e9   : > { %v932_v47 = vpop.f32.mrb[14].mxu1  ;;  %v1194_v48 = vsel %vm1187_vm6, %v1181_v24, -inf }
 0x2ea   : > { %1195 = vmax.xlane.f32.xlu0 %v1194_v48  ;;  %v2224_v49 = vpop.f32.mrb[15].mxu1 }
 0x2ef   : > { %v975_v50 = vpop.f32.mrb[16].mxu1 }
 0x2f0   : > { %v1182_v51 = vsel %vm3177_vm7, -1e+30, %v975_v50  ;;  %v2229_v52 = vpop.f32.mrb[17].mxu1 }
 0x2f1   : > { %v978_v53 = vpop.f32.mrb[18].mxu1  ;;  %v1197_v54 = vsel %vm1187_vm6, %v1182_v51, -inf }
 0x2f2   : > { %1198 = vmax.xlane.f32.xlu0 %v1197_v54  ;;  %v2230_v55 = vpop.f32.mrb[19].mxu1 }
 0x2f7   : > { %v1021_v56 = vpop.f32.mrb[20].mxu1 }
 0x2f8   : > { %v3208_v57 = vsel %vm3166_vm5, -1e+30, %v1021_v56  ;;  %v2235_v58 = vpop.f32.mrb[21].mxu1 }
 0x2f9   : > { %v1024_v59 = vpop.f32.mrb[22].mxu1  ;;  %v1200_v60 = vsel %vm1187_vm6, %v3208_v57, -inf }
 0x2fa   : > { %1201 = vmax.xlane.f32.xlu1 %v1200_v60  ;;  %v2236_v61 = vpop.f32.mrb[23].mxu1 }
 0x2ff   : > { %v1067_v62 = vpop.f32.mrb[24].mxu1 }
 0x300   : > { %v1184_v63 = vsel %vm3177_vm7, -1e+30, %v1067_v62  ;;  %v2241_v1 = vpop.f32.mrb[25].mxu1 }
 0x301   : > { %v1070_v2 = vpop.f32.mrb[26].mxu1  ;;  %v1203_v3 = vsel %vm1187_vm6, %v1184_v63, -inf }
 0x302   : > { %1204 = vmax.xlane.f32.xlu0 %v1203_v3  ;;  %v2242_v4 = vpop.f32.mrb[27].mxu1  ;;  %v2057_v2 = vsel %vm1282_vm9, 1.0, %v2746_v0 }
 0x303   : > { %v3275_v4 = vrot.slane %v2057_v2, %v3163_v14 }
 0x304   : > { %v1190_v18 = vpop.xlane.xlu0 %1189 }
 0x305   : > { %v1212_v20 = vsub.f32 %v3172_v21, %v1190_v18 }
 0x307   : > { %v1113_v5 = vpop.f32.mrb[28].mxu1  ;;  %v1220_v22 = vmul.f32 1.442695, %v1212_v20 }
 0x308   : > { %v3217_v6 = vsel %vm3166_vm5, -1e+30, %v1113_v5  ;;  %v2247_v7 = vpop.f32.mrb[29].mxu1 }
 0x309   : > { %v1116_v8 = vpop.f32.mrb[30].mxu1  ;;  %v1206_v9 = vsel %vm1187_vm6, %v3217_v6, -inf  ;;  %2472 = vpow2.f32 %v1220_v22 }
 0x30a   : > { %1207 = vmax.xlane.f32.xlu1 %v1206_v9  ;;  %v2248_v10 = vpop.f32.mrb[31].mxu1 }
 0x30c   : > { %v1193_v25 = vpop.xlane.xlu1 %1192 }
 0x30d   : > { %v1213_v26 = vsub.f32 %v3183_v31, %v1193_v25 }
 0x30f   : > { %v1159_v11 = vpop.f32.mrb[32].mxu1  ;;  %v1222_v27 = vmul.f32 1.442695, %v1213_v26 }
 0x310   : > { %v1186_v12 = vsel %vm3177_vm7, -1e+30, %v1159_v11  ;;  %v2253_v13 = vpop.f32.mrb[33].mxu1 }
 0x311   : > { %v1162_v15 = vpop.f32.mrb[34].mxu1  ;;  %v1209_v16 = vsel %vm1187_vm6, %v1186_v12, -inf  ;;  %2474 = vpow2.f32 %v1222_v27 }
 0x312   : > { %1210 = vmax.xlane.f32.xlu0 %v1209_v16  ;;  %v2254_v17 = vpop.f32.mrb[35].mxu1 }
 0x313   : > { %v3232_v28 = vpop.eup %2472 }
 0x314   : > { %v1236_v29 = vsel %vm1187_vm6, %v3232_v28, 0.0 }
 0x31b   : > { %786 = vrot.lane.b32.xlu1 %v3192_v42, %s2749_s9  ;;  %v3236_v30 = vpop.eup %2474 }
 0x31c   : > { %v1239_v32 = vsel %vm1187_vm6, %v3236_v30, 0.0 }
 0x328   : > { %784 = vrot.lane.b32.xlu0 %v3188_v41, %s2749_s9 }
 0x33f   : > { %1237 = vadd.xlane.f32.xlu1 %v1236_v29 }
 0x347   : > { %1240 = vadd.xlane.f32.xlu0 %v1239_v32 }
 0x350   : > { %788 = vrot.lane.b32.xlu1 %v3188_v41, %s2750_s11 }
 0x377   : > { %v1196_v21 = vpop.xlane.xlu0 %1195 }
 0x378   : > { %v1214_v33 = vsub.f32 %v1181_v24, %v1196_v21 }
 0x37a   : > { %v1224_v31 = vmul.f32 1.442695, %v1214_v33 }
 0x37c   : > { %2476 = vpow2.f32 %v1224_v31 }
 0x37f   : > { %v1199_v34 = vpop.xlane.xlu0 %1198 }
 0x380   : > { %v1215_v35 = vsub.f32 %v1182_v51, %v1199_v34 }
 0x382   : > { %v1226_v36 = vmul.f32 1.442695, %v1215_v35 }
 0x384   : > { %2478 = vpow2.f32 %v1226_v36 }
 0x386   : > { %v3242_v37 = vpop.eup %2476 }
 0x387   : > { %v1242_v38 = vsel %vm1187_vm6, %v3242_v37, 0.0  ;;  %v1202_v50 = vpop.xlane.xlu1 %1201 }
 0x388   : > { %1243 = vadd.xlane.f32.xlu0 %v1242_v38  ;;  %v1216_v51 = vsub.f32 %v3208_v57, %v1202_v50 }
 0x38a   : > { %v1228_v53 = vmul.f32 1.442695, %v1216_v51 }
 0x38e   : > { %v3246_v39 = vpop.eup %2478 }
 0x38f   : > { %v1205_v40 = vpop.xlane.xlu0 %1204  ;;  %v1245_v43 = vsel %vm1187_vm6, %v3246_v39, 0.0 }
 0x390   : > { %v1217_v44 = vsub.f32 %v1184_v63, %v1205_v40  ;;  %1246 = vadd.xlane.f32.xlu1 %v1245_v43 }
 0x392   : > { %v1230_v45 = vmul.f32 1.442695, %v1217_v44 }
 0x394   : > { %2480 = vpow2.f32 %v1230_v45 }
 0x397   : > { %v1208_v52 = vpop.xlane.xlu1 %1207 }
 0x398   : > { %v1218_v54 = vsub.f32 %v3217_v6, %v1208_v52 }
 0x39a   : > { %v1232_v56 = vmul.f32 1.442695, %v1218_v54 }
 0x39b   : > { %v787_v62 = vpop.permute.xlu1 %786 }
 0x39e   : > { %v3250_v24 = vpop.eup %2480  ;;  %790 = vrot.lane.b32.xlu0 %v3192_v42, %s2750_s11 }
 0x39f   : > { %v1211_v46 = vpop.xlane.xlu0 %1210  ;;  %v1251_v47 = vsel %vm1187_vm6, %v3250_v24, 0.0 }
 0x3a0   : > { %v1219_v48 = vsub.f32 %v1186_v12, %v1211_v46  ;;  %1252 = vadd.xlane.f32.xlu1 %v1251_v47  ;;  %v1472_v12 = vsel %vm1332_vm8, %v787_v62, 0 }
 0x3a2   : > { %v1234_v49 = vmul.f32 1.442695, %v1219_v48 }
 0x3a3   : > { %v785_v1 = vpop.permute.xlu0 %784 }
 0x3a4   : > { %2482 = vpow2.f32 %v1234_v49  ;;  %v1426_v10 = vsel %vm1332_vm8, %v785_v1, 0 }
 0x3a5   : > { %2484 = vpow2.f32 %v1228_v53 }
 0x3a6   : > { %2486 = vpow2.f32 %v1232_v56 }
 0x3ae   : > { %v3258_v55 = vpop.eup %2482 }
 0x3af   : > { %v1257_v58 = vsel %vm1187_vm6, %v3258_v55, 0.0  ;;  %v3262_v59 = vpop.eup %2484 }
 0x3b0   : > { %1258 = vadd.xlane.f32.xlu1 %v1257_v58  ;;  %v1248_v60 = vsel %vm1187_vm6, %v3262_v59, 0.0  ;;  %v3266_v61 = vpop.eup %2486 }
 0x3b1   : > { %v1254_v57 = vsel %vm1187_vm6, %v3266_v61, 0.0 }
 0x3bd   : > { %1249 = vadd.xlane.f32.xlu0 %v1248_v60 }
 0x3c1   : > { %1255 = vadd.xlane.f32.xlu0 %v1254_v57  ;;  %792 = vrot.lane.b32.xlu1 %v3188_v41, %s2751_s13  ;;  %v1300_v41 = vsub.s32 1, %v3086_v23 }
 0x3c3   : > { %v1301_v9 = vrot.slane %v2057_v2, %v1300_v41 }
 0x3cc   : > { %v1238_v63 = vpop.xlane.xlu1 %1237 }
 0x3cd   : > { %2488 = vrcp.f32 %v1238_v63 }
 0x3d0   : > { %v789_v15 = vpop.permute.xlu1 %788 }
 0x3d1   : > { %v1518_v22 = vsel %vm1332_vm8, %v789_v15, 0  ;;  %v2470_v15 = vld [vmem:[#allocation10 + $0x30] sm:$0xff]  }
 0x3d4   : > { %v1241_v3 = vpop.xlane.xlu0 %1240 }
 0x3d5   : > { %2490 = vrcp.f32 %v1241_v3 }
 0x3d7   : > { %v2489_v5 = vpop.eup %2488  ;;  %794 = vrot.lane.b32.xlu0 %v3192_v42, %s2751_s13 }
 0x3d8   : > { %v1304_v6 = vmul.f32 %v2489_v5, %v3275_v4 }
 0x3da   : > { %v1312_v7 = vmul.f32 %v3232_v28, %v1304_v6 }
 0x3dc   : > { %v1320_v8 = vpack.c.bf16 %v1312_v7, %v1312_v7  ;;  %v2464_v7 = vld [vmem:[#allocation10] sm:$0xff]  }
 0x3de   : > { %2258 = vmatmul.mubr.msk.bf16.vlgmr.msra.gmra.mrb[8].mxu0 %vm1328_vm10, %v1320_v8  ;;  %v2465_v8 = vld [vmem:[#allocation10 + $0x8] sm:$0xff]  }
 0x3df   : > { %v2491_v11 = vpop.eup %2490  ;;  %2268 = vmatpush3.bf16.msra.mxu0 %v1426_v10  ;;  %2269 = vmatprep.mubr.msk.bf16.mxu0 %vm2747_vm0, %v2746_v0  ;;  %v2467_v10 = vld [vmem:[#allocation10 + $0x18] sm:$0xff]  }
 0x3e0   : > { %v1305_v14 = vmul.f32 %v2491_v11, %v1301_v9  ;;  %2279 = vmatprep.subr.bf16.mxu0 %v2746_v0 }
 0x3e2   : > { %v1313_v42 = vmul.f32 %v3236_v30, %v1305_v14 }
 0x3e4   : > { %v1321_v23 = vpack.c.bf16 %v1313_v42, %v1313_v42 }
 0x3e6   : > { %2264 = vmatmul.mubr.msk.bf16.vlgmr.msra.gmra.mrb[36].mxu1 %vm1328_vm10, %v1321_v23 }
 0x3e7   : > { %2274 = vmatpush3.bf16.msra.mxu1 %v1472_v12  ;;  %2275 = vmatprep.mubr.msk.bf16.mxu1 %vm2747_vm0, %v2746_v0  ;;  %v2468_v12 = vld [vmem:[#allocation10 + $0x20] sm:$0xff]  }
 0x3e8   : > { %2285 = vmatprep.subr.bf16.mxu1 %v2746_v0 }
 0x415   : > { %v1244_v13 = vpop.xlane.xlu0 %1243 }
 0x416   : > { %2492 = vrcp.f32 %v1244_v13  ;;  %v2469_v13 = vld [vmem:[#allocation10 + $0x28] sm:$0xff]  }
 0x419   : > { %v791_v28 = vpop.permute.xlu0 %790 }
 0x41a   : > { %v1564_v32 = vsel %vm1332_vm8, %v791_v28, 0 }
 0x41d   : > { %v1247_v16 = vpop.xlane.xlu1 %1246 }
 0x41e   : > { %2494 = vrcp.f32 %v1247_v16 }
 0x420   : > { %v2493_v17 = vpop.eup %2492 }
 0x421   : > { %v1306_v18 = vmul.f32 %v2493_v17, %v3275_v4 }
 0x423   : > { %v1314_v19 = vmul.f32 %v3242_v37, %v1306_v18 }
 0x425   : > { %v1322_v20 = vpack.c.bf16 %v1314_v19, %v1314_v19  ;;  %v2471_v19 = vld [vmem:[#allocation10 + $0x38] sm:$0xff]  }
 0x427   : > { %2270 = vmatmul.mubr.msk.bf16.vlgmr.msra.gmra.mrb[12].mxu0 %vm1328_vm10, %v1322_v20 }
 0x428   : > { %v2495_v25 = vpop.eup %2494  ;;  %2280 = vmatpush3.bf16.msra.mxu0 %v1518_v22  ;;  %2281 = vmatprep.mubr.msk.bf16.mxu0 %vm2747_vm0, %v2746_v0 }
 0x429   : > { %v1307_v26 = vmul.f32 %v2495_v25, %v1301_v9  ;;  %2291 = vmatprep.subr.bf16.mxu0 %v2746_v0 }
 0x42b   : > { %v1315_v27 = vmul.f32 %v3246_v39, %v1307_v26 }
 0x42d   : > { %v1253_v29 = vpop.xlane.xlu1 %1252  ;;  %v1323_v30 = vpack.c.bf16 %v1315_v27, %v1315_v27 }
 0x42e   : > { %2496 = vrcp.f32 %v1253_v29 }
 0x42f   : > { %2276 = vmatmul.mubr.msk.bf16.vlgmr.msra.gmra.mrb[40].mxu1 %vm1328_vm10, %v1323_v30 }
 0x430   : > { %2286 = vmatpush3.bf16.msra.mxu1 %v1564_v32  ;;  %2287 = vmatprep.mubr.msk.bf16.mxu1 %vm2747_vm0, %v2746_v0 }
 0x431   : > { %2297 = vmatprep.subr.bf16.mxu1 %v2746_v0 }
 0x438   : > { %v2497_v21 = vpop.eup %2496 }
 0x439   : > { %v1309_v33 = vmul.f32 %v2497_v21, %v1301_v9 }
 0x43b   : > { %v1317_v31 = vmul.f32 %v3250_v24, %v1309_v33 }
 0x43d   : > { %v1259_v34 = vpop.xlane.xlu1 %1258  ;;  %v1325_v35 = vpack.c.bf16 %v1317_v31, %v1317_v31 }
 0x43e   : > { %2498 = vrcp.f32 %v1259_v34 }
 0x43f   : > { %2288 = vmatmul.mubr.msk.bf16.vlgmr.msra.gmra.mrb[44].mxu1 %vm1328_vm10, %v1325_v35 }
 0x440   : > { %2299 = vmatprep.mubr.msk.bf16.mxu1 %vm2747_vm0, %v2746_v0 }
 0x441   : > { %v793_v49 = vpop.permute.xlu1 %792 }
 0x442   : > { %v1610_v52 = vsel %vm1332_vm8, %v793_v49, 0 }
 0x448   : > { %v2499_v36 = vpop.eup %2498 }
 0x449   : > { %v1311_v38 = vmul.f32 %v2499_v36, %v1301_v9  ;;  %v2466_v9 = vld [vmem:[#allocation10 + $0x10] sm:$0xff]  }
 0x44a   : > { %v1250_v37 = vpop.xlane.xlu0 %1249 }
 0x44b   : > { %2500 = vrcp.f32 %v1250_v37  ;;  %v1319_v40 = vmul.f32 %v3258_v55, %v1311_v38 }
 0x44d   : > { %v1327_v24 = vpack.c.bf16 %v1319_v40, %v1319_v40 }
 0x44e   : > { %v1256_v39 = vpop.xlane.xlu0 %1255 }
 0x44f   : > { %2502 = vrcp.f32 %v1256_v39 }
 0x452   : > { %v795_v43 = vpop.permute.xlu0 %794 }
 0x453   : > { %v1656_v44 = vsel %vm1332_vm8, %v795_v43, 0 }
 0x454   : > { %2298 = vmatpush3.bf16.msra.mxu1 %v1656_v44 }
 0x455   : > { %v2501_v45 = vpop.eup %2500 }
 0x456   : > { %v1308_v46 = vmul.f32 %v2501_v45, %v3275_v4 }
 0x457   : > { %2300 = vmatmul.mubr.msk.bf16.vlgmr.msra.gmra.mrb[48].mxu1 %vm1328_vm10, %v1327_v24  ;;  %v2066_v24 = vld [vmem:[%s3441_s24] ss:$0 sm:$0xff] }
 0x458   : > { %v1316_v47 = vmul.f32 %v3262_v59, %v1308_v46 }
 0x459   : > { %v2503_v48 = vpop.eup %2502 }
 0x45a   : > { %v1310_v50 = vmul.f32 %v2503_v48, %v3275_v4  ;;  %v1324_v51 = vpack.c.bf16 %v1316_v47, %v1316_v47 }
 0x45c   : > { %2282 = vmatmul.mubr.msk.bf16.vlgmr.msra.gmra.mrb[16].mxu0 %vm1328_vm10, %v1324_v51  ;;  %v1318_v53 = vmul.f32 %v3266_v61, %v1310_v50 }
 0x45d   : > { %2292 = vmatpush3.bf16.msra.mxu0 %v1610_v52  ;;  %2293 = vmatprep.mubr.msk.bf16.mxu0 %vm2747_vm0, %v2746_v0 }
 0x45e   : > { %2303 = vmatprep.subr.bf16.mxu0 %v2746_v0  ;;  %v1326_v54 = vpack.c.bf16 %v1318_v53, %v1318_v53 }
 0x464   : > { %2294 = vmatmul.mubr.msk.bf16.vlgmr.msra.gmra.mrb[20].mxu0 %vm1328_vm10, %v1326_v54 }
 0x465   : > { %2319 = vmatprep.mubr.msk.bf16.mxu0 %vm2747_vm0, %v2746_v0  ;;  %2304 = vmatpush3.bf16.msra.mxu0 %v2464_v7 }
 0x466   : > { %2305 = vmatprep.subr.bf16.mxu0 %v2746_v0 }
 0x469   : > { %2306 = vmatpush3.bf16.msra.mxu0 %v2465_v8 }
 0x46a   : > { %2307 = vmatprep.subr.bf16.mxu0 %v2746_v0 }
 0x46d   : > { %2308 = vmatpush3.bf16.msra.mxu0 %v2466_v9 }
 0x46e   : > { %2309 = vmatprep.subr.bf16.mxu0 %v2746_v0 }
 0x471   : > { %2310 = vmatpush3.bf16.msra.mxu0 %v2467_v10 }
 0x472   : > { %2311 = vmatprep.subr.bf16.mxu0 %v2746_v0 }
 0x475   : > { %2312 = vmatpush3.bf16.msra.mxu0 %v2468_v12 }
 0x476   : > { %2313 = vmatprep.subr.bf16.mxu0 %v2746_v0 }
 0x479   : > { %2314 = vmatpush3.bf16.msra.mxu0 %v2469_v13 }
 0x47a   : > { %2315 = vmatprep.subr.bf16.mxu0 %v2746_v0 }
 0x47d   : > { %2316 = vmatpush3.bf16.msra.mxu0 %v2470_v15 }
 0x47e   : > { %2317 = vmatprep.subr.bf16.mxu0 %v2746_v0 }
 0x481   : > { %2318 = vmatpush3.bf16.msra.mxu0 %v2471_v19 }
 0x4b1   : > { %v3325_v55 = vpop.f32.mrb[8].mxu0 }
 0x4b2   : > { %v2259_v56 = vpop.f32.mrb[9].mxu0 }
 0x4b3   : > { %v1373_v58 = vpop.f32.mrb[10].mxu0 }
 0x4b4   : > { %v2260_v59 = vpop.f32.mrb[11].mxu0 }
 0x4b9   : > { %v3327_v60 = vpop.f32.mrb[36].mxu1 }
 0x4ba   : > { %v2265_v57 = vpop.f32.mrb[37].mxu1 }
 0x4bb   : > { %v1419_v62 = vpop.f32.mrb[38].mxu1 }
 0x4bc   : > { %v2266_v63 = vpop.f32.mrb[39].mxu1 }
 0x4fa   : > { %v1462_v1 = vpop.f32.mrb[12].mxu0 }
 0x4fb   : > { %1700 = vrot.lane.b32.xlu1 %v1462_v1, %s2751_s13  ;;  %v2271_v61 = vpop.f32.mrb[13].mxu0 }
 0x4fc   : > { %v1465_v2 = vpop.f32.mrb[14].mxu0 }
 0x4fd   : > { %v2272_v3 = vpop.f32.mrb[15].mxu0 }
 0x502   : > { %v1508_v4 = vpop.f32.mrb[40].mxu1 }
 0x503   : > { %1702 = vrot.lane.b32.xlu0 %v1508_v4, %s2751_s13  ;;  %v2277_v5 = vpop.f32.mrb[41].mxu1 }
 0x504   : > { %v1511_v6 = vpop.f32.mrb[42].mxu1 }
 0x505   : > { %v2278_v41 = vpop.f32.mrb[43].mxu1 }
 0x512   : > { %v1600_v11 = vpop.f32.mrb[44].mxu1 }
 0x513   : > { %1710 = vrot.lane.b32.xlu0 %v1600_v11, %s2750_s11  ;;  %v2289_v14 = vpop.f32.mrb[45].mxu1 }
 0x514   : > { %v1603_v42 = vpop.f32.mrb[46].mxu1 }
 0x515   : > { %v2290_v23 = vpop.f32.mrb[47].mxu1 }
 0x52a   : > { %v1692_v16 = vpop.f32.mrb[48].mxu1 }
 0x52b   : > { %1718 = vrot.lane.b32.xlu0 %v1692_v16, %s2749_s9  ;;  %v2301_v17 = vpop.f32.mrb[49].mxu1 }
 0x52c   : > { %v1695_v18 = vpop.f32.mrb[50].mxu1 }
 0x52d   : > { %v2302_v20 = vpop.f32.mrb[51].mxu1 }
 0x52f   : > { %v1554_v22 = vpop.f32.mrb[16].mxu0 }
 0x530   : > { %1708 = vrot.lane.b32.xlu1 %v1554_v22, %s2750_s11  ;;  %v2283_v25 = vpop.f32.mrb[17].mxu0  ;;  %s3442_s11 = sld [smem:[#allocation19_spill]] }
 0x531   : > { %v1557_v26 = vpop.f32.mrb[18].mxu0 }
 0x532   : > { %v2284_v27 = vpop.f32.mrb[19].mxu0 }
 0x536   : > { %s3356_s22 = scalar_lea.hbm %s3442_s11, %s2076_s21 }
 0x537   : > { %v1646_v28 = vpop.f32.mrb[20].mxu0 }
 0x538   : > { %1716 = vrot.lane.b32.xlu1 %v1646_v28, %s2749_s9  ;;  %v2295_v29 = vpop.f32.mrb[21].mxu0 }
 0x539   : > { %v1649_v30 = vpop.f32.mrb[22].mxu0 }
 0x53a   : > { %v2296_v32 = vpop.f32.mrb[23].mxu0 }
 0x56d   : > { %v1701_v21 = vpop.permute.xlu1 %1700 }
 0x56e   : > { %v1722_v35 = vsel %vm796_vm1, %v3325_v55, %v1701_v21 }
 0x575   : > { %v1703_v0 = vpop.permute.xlu0 %1702 }
 0x576   : > { %v1723_v36 = vsel %vm796_vm1, %v3327_v60, %v1703_v0 }
 0x585   : > { %v1711_v33 = vpop.permute.xlu0 %1710 }
 0x586   : > { %v1726_v37 = vsel %vm1724_vm11, %v1723_v36, %v1711_v33 }
 0x59d   : > { %v1719_v34 = vpop.permute.xlu0 %1718 }
 0x59e   : > { %v1729_v40 = vsel %vm1727_vm12, %v1726_v37, %v1719_v34 }
 0x5a2   : > { %v1709_v31 = vpop.permute.xlu1 %1708 }
 0x5a3   : > { %v1725_v38 = vsel %vm1724_vm11, %v1722_v35, %v1709_v31 }
 0x5aa   : > { %v1717_v39 = vpop.permute.xlu1 %1716 }
 0x5ab   : > { %v1728_v43 = vsel %vm1727_vm12, %v1725_v38, %v1717_v39 }
 0x5ac   : > { %v1732_v44 = vcombine.low %v1728_v43, %v1729_v40 }
 0x5ae   : > { %v1734_v45 = vpack.c.bf16 %v1732_v44, %v1732_v44 }
 0x5b0   : > { %2320 = vmatmul.mubr.bf16.vlgmr.msra.gmra.mrb[24].mxu0 %v1734_v45 }
 0x683   : > { %v1840_v46 = vpop.f32.mrb[24].mxu0 }
 0x684   : > { %v1841_v47 = vadd.f32 %v2066_v24, %v1840_v46  ;;  %v2321_v48 = vpop.f32.mrb[25].mxu0 }
 0x685   : > { %v1843_v49 = vpop.f32.mrb[26].mxu0 }
 0x686   : > { %v1847_v50 = vcombine.high %v1841_v47, %v1841_v47  ;;  %v1849_v51 = vpack.c.bf16 %v1841_v47, %v1841_v47  ;;  %v2322_v52 = vpop.f32.mrb[27].mxu0 }
 0x688   : > { %v1850_v53 = vpack.c.bf16 %v1847_v50, %v1847_v50  ;;  %1851 = vst [vmem:[%s396_s16] sm:$0x3] %v1849_v51 }
 0x68a   : > { %1852 = vst [vmem:[%s396_s16 + $0x2] sm:$0x3] %v1850_v53 }
 0x68b   : > { %2659 = shalt.err (!%p2656_p4)
}
 0x68c   : > { %s2660_s6 = scalar_lea.hbm %s3356_s22, 64  ;;  %s2664_s24 = scalar_lea.hbm %s3442_s11, 512 }
 0x68d   : > { %p2661_p12 = scmp.ne.s32.totalorder %s3356_s22, %s2660_s6  ;;  %p2665_p1 = scmp.lt.u32.totalorder %s3356_s22, %s3442_s11 }
 0x68e   : > { %p2666_p10 = scmp.lt.u32.totalorder %s2664_s24, %s2660_s6  ;;  %p2668_p6 = scmp.lt.u32.totalorder %s2660_s6, %s3356_s22 }
 0x68f   : > { %p2662_p2 = pnand %p2661_p12, %p2980_p5 }
 0x690   : > { %p2667_p8 = por %p2666_p10, %p2665_p1 }
 0x691   : > { %p2663_p11 = pneg %p2662_p2 }
 0x692   : > { %p2669_p0 = por %p2668_p6, %p2667_p8 }
 0x694   : > { %p2670_p3 = pnand %p2669_p0, %p2663_p11 }
 0x696   : > { %2673 = shalt.err (!%p2670_p3)
}
 0x697   : > { %s2755_s30 = smov 256   ;;  %s2756_s9 = smov 2  }
 0x698   : > { %2341 = dma.vmem_to_hbm [thread:$0]  (%p2980_p5), %s3351_s19, 64, %s3356_s22, %s1854_s23, %s2751_s13, %s2755_s30, %s2756_s9  }
 0x699 PF: > { %s3443_s15 = sld [smem:[#allocation16_spill]]  ;;  %s3444_s27 = sld [smem:[#allocation17_spill]] }
 0x69a   : > { %p2373_p7 = scmp.ge.s32.totalorder %s2736_s29, 2 }
 0x69f   : > { %s1884_s20 = sand.u32 1, %s3443_s15   ;;  %p3445_p9 = scmp.ne.s32.totalorder %s3444_s27, 0 }
 0x6a0   : > { %s1885_s18 = scalar_lea.sflag [#allocation4], %s1884_s20 }
 0x6a1   : > { %p2361_p13 = pnand %p2373_p7, %p3445_p9 }
 0x6a3   : > { %2711 = dma.done.wait (!%p2361_p13), %s1885_s18, 64  }
 0x6a4   : > { %2713 = vsyncadd (!%p2361_p13), %s1885_s18, 4294967232  ;;  %s25_s29 = sadd.s32 1, %s2736_s29   ;;  %s3446_s24 = smov %s2720_s25 }
 0x6a5   : > { %p22_p4 = scmp.ge.s32.totalorder %s25_s29, 10   ;;  %s3447_s25 = smov %s2724_s26 }
 0x6a6   : > { %s3448_s26 = smov %s2989_s17  ;;  %s3449_s27 = smov %s2732_s28 }
 0x6a7   : > { %s3450_s28 = smov %s3452_s14  ;;  %24 = sbr.rel (!%p22_p4) target bundleno = 11 (0xb), region = 112 }
 0x6ae   :  { %1890 = vsyncpa [#allocation3], 1 }
 0x6af   :  { %1892 = vsyncpa [#allocation3 + $0x1], 1 }
 0x6b0   :  { %1893 = vsyncpa [#allocation6], 1 }
 0x6b1   :  { %1894 = vsyncpa [#allocation9], 1 }
 0x6b2   :  { %1895 = vsyncpa [#allocation4], 1 }
 0x6b3   :  { %1897 = vsyncpa [#allocation4 + $0x1], 1 }

</bundles_post_ra>
